<compile_context>
chip_gen: v7x
topology: tpu7x:2x2x1
jax: 0.10.0
libtpu: 0.0.40
codegen_flags: <defaults>
</compile_context>

<pallas_src>
import jax
import jax.numpy as jnp
from jax.experimental import pallas as pl
from jax.experimental.pallas import tpu as pltpu

H = 256   # hidden size fixed by the module (Linear(256, 256), Linear(512, 256))


def _round_up(x, m):
    return ((x + m - 1) // m) * m


def cross_interaction_kernel(
    xs_ref, xg_ref,
    w0a_ref, b0a_ref, w0b_ref, b0b_ref,
    w1a_ref, b1a_ref, w1b_ref, b1b_ref,
    wls_ref, wlg_ref, bl_ref,
    o_ref,
):
    xs_bf = xs_ref[...]                     # (tm, H) bf16 rows of x_seq
    xg_bf = xg_ref[...]                     # (tm, H) bf16 rows of x_graph
    xs = xs_bf.astype(jnp.float32)          # f32 copies for the row-dot / scale path
    xg = xg_bf.astype(jnp.float32)

    # Final-linear halves first: independent of ci0/ci1, so the MXU stays fed
    # while the reduce/tanh chain drains later (scale is commuted onto results).
    ys = jnp.dot(xs_bf, wls_ref[...], preferred_element_type=jnp.float32)   # (tm, H)
    yg = jnp.dot(xg_bf, wlg_ref[...], preferred_element_type=jnp.float32)   # (tm, H)

    # crossInteraction0(x_graph) = Linear -> ReLU -> Linear (bf16 MXU, f32 acc)
    h0 = jnp.dot(xg_bf, w0a_ref[...], preferred_element_type=jnp.float32) + b0a_ref[...]
    h0 = jnp.maximum(h0, 0.0)
    h0 = jnp.dot(h0.astype(jnp.bfloat16), w0b_ref[...],
                 preferred_element_type=jnp.float32) + b0b_ref[...]
    # einsum('bij,bij->bi', MLP0(x_graph), x_seq) -> per-row dot, f32 (XLU+EUP)
    ci0 = jnp.tanh(jnp.sum(h0 * xs, axis=-1, keepdims=True)) + 1.0          # (tm, 1)

    # crossInteraction1(x_seq) = Linear -> ReLU -> Linear
    h1 = jnp.dot(xs_bf, w1a_ref[...], preferred_element_type=jnp.float32) + b1a_ref[...]
    h1 = jnp.maximum(h1, 0.0)
    h1 = jnp.dot(h1.astype(jnp.bfloat16), w1b_ref[...],
                 preferred_element_type=jnp.float32) + b1b_ref[...]
    ci1 = jnp.tanh(jnp.sum(h1 * xg, axis=-1, keepdims=True)) + 1.0          # (tm, 1)

    # linear(concat(x_seq*ci0, x_graph*ci1)) == ci0*(xs@Wls) + ci1*(xg@Wlg) + b
    o_ref[...] = (ci0 * ys + ci1 * yg + bl_ref[...]).astype(o_ref.dtype)


def prepare_params(params):
    """One-time conversion to kernel-ready layout: bf16 weights ([in,out]),
    f32 biases reshaped to (1, H), and the 512->256 weight split into the
    x_seq half and the x_graph half."""
    (w0a, b0a, w0b, b0b, w1a, b1a, w1b, b1b, wl, bl) = params
    bf = jnp.bfloat16
    f32 = jnp.float32
    return (
        w0a.astype(bf), b0a.reshape(1, H).astype(f32),
        w0b.astype(bf), b0b.reshape(1, H).astype(f32),
        w1a.astype(bf), b1a.reshape(1, H).astype(f32),
        w1b.astype(bf), b1b.reshape(1, H).astype(f32),
        wl[:H, :].astype(bf),      # (256, 256)  x_seq half
        wl[H:, :].astype(bf),      # (256, 256)  x_graph half
        bl.reshape(1, H).astype(f32),
    )


def cross_interaction(x_seq, x_graph, prepared_params, *, tm=512, target_grid_steps=4):
    B, I, Hd = x_seq.shape
    assert Hd == H and x_graph.shape == x_seq.shape
    M = B * I

    # Row tile: multiple of 16 (bf16 sublane packing); clamped so the grid keeps
    # >= target_grid_steps steps (v7x megacore sharding) but never exceeds the
    # 16-rounded problem size (so tiny test shapes aren't padded to 512 rows).
    tm_eff = min(tm, max(16, _round_up(pl.cdiv(M, target_grid_steps), 16)))
    tm_eff = min(tm_eff, _round_up(M, 16))
    grid = (pl.cdiv(M, tm_eff),)          # no jnp.pad: partial last block is masked

    # bf16 activation I/O halves HBM traffic (the binding resource on v6e/v7x).
    # NOTE: if the producer already emits bf16 this cast is a no-op.
    xs = x_seq.reshape(M, H).astype(jnp.bfloat16)
    xg = x_graph.reshape(M, H).astype(jnp.bfloat16)

    row_in_spec = pl.BlockSpec((tm_eff, H), lambda i: (i, 0))
    row_out_spec = pl.BlockSpec((tm_eff, H), lambda i: (i, 0))
    mat_spec = pl.BlockSpec((H, H), lambda i: (0, 0))      # grid-invariant weights
    bias_spec = pl.BlockSpec((1, H), lambda i: (0, 0))

    cost = pl.CostEstimate(
        flops=6 * 2 * M * H * H,                              # six (tm,256)x(256,256) matmuls
        transcendentals=2 * M,                                # two tanh per row
        bytes_accessed=2 * M * H * 2 + M * H * 4 + 6 * H * H * 2 + 5 * H * 4,
    )

    out = pl.pallas_call(
        cross_interaction_kernel,
        out_shape=jax.ShapeDtypeStruct((M, H), jnp.float32),
        grid_spec=pltpu.PrefetchScalarGridSpec(
            num_scalar_prefetch=0,
            grid=grid,
            in_specs=[
                row_in_spec, row_in_spec,                     # x_seq, x_graph rows
                mat_spec, bias_spec, mat_spec, bias_spec,     # crossInteraction0
                mat_spec, bias_spec, mat_spec, bias_spec,     # crossInteraction1
                mat_spec, mat_spec, bias_spec,                # final linear (split)
            ],
            out_specs=row_out_spec,
        ),
        compiler_params=pltpu.CompilerParams(
            dimension_semantics=("parallel",),
            vmem_limit_bytes=32 * 1024 * 1024,   # actual need ~10 MiB at tm=512
        ),
        cost_estimate=cost,
    )(xs, xg, *prepared_params)

    return out.reshape(B, I, H)


def init_params(key):
    """Deterministic synthetic parameters.

    Linear weights are created directly in [in, out] layout (the transpose of
    PyTorch's [out, in] storage) so the kernel computes x @ W + b.
    """
    ks = jax.random.split(key, 10)
    s = 0.05
    w0a = s * jax.random.normal(ks[0], (H, H), jnp.float32)
    b0a = s * jax.random.normal(ks[1], (H,), jnp.float32)
    w0b = s * jax.random.normal(ks[2], (H, H), jnp.float32)
    b0b = s * jax.random.normal(ks[3], (H,), jnp.float32)
    w1a = s * jax.random.normal(ks[4], (H, H), jnp.float32)
    b1a = s * jax.random.normal(ks[5], (H,), jnp.float32)
    w1b = s * jax.random.normal(ks[6], (H, H), jnp.float32)
    b1b = s * jax.random.normal(ks[7], (H,), jnp.float32)
    wl = s * jax.random.normal(ks[8], (2 * H, H), jnp.float32)   # 512 -> 256
    bl = s * jax.random.normal(ks[9], (H,), jnp.float32)
    return (w0a, b0a, w0b, b0b, w1a, b1a, w1b, b1b, wl, bl)


def reference_f32(x_seq, x_graph, params):
    """Module-faithful pure-f32 forward (mirrors the PyTorch code)."""
    (w0a, b0a, w0b, b0b, w1a, b1a, w1b, b1b, wl, bl) = params
    mlp0 = jnp.dot(jnp.maximum(jnp.dot(x_graph, w0a) + b0a, 0.0), w0b) + b0b
    mlp1 = jnp.dot(jnp.maximum(jnp.dot(x_seq, w1a) + b1a, 0.0), w1b) + b1b
    ci0 = jnp.tanh(jnp.einsum("bij,bij->bi", mlp0, x_seq)) + 1.0
    ci1 = jnp.tanh(jnp.einsum("bij,bij->bi", mlp1, x_graph)) + 1.0
    xs = jnp.einsum("bij,bi->bij", x_seq, ci0)
    xg = jnp.einsum("bij,bi->bij", x_graph, ci1)
    x = jnp.concatenate([xs, xg], axis=2)
    return jnp.dot(x, wl) + bl


def reference_matched(x_seq, x_graph, params):
    """Pure-JAX reference mirroring the kernel's precision strategy exactly:
    bf16 activations & weights on the MXU with f32 accumulation, f32 row-dot /
    tanh, and the per-row ci scale commuted onto the final matmul results."""
    (w0a, b0a, w0b, b0b, w1a, b1a, w1b, b1b, wl, bl) = params
    bf = jnp.bfloat16

    xs_b = x_seq.astype(bf)
    xg_b = x_graph.astype(bf)
    xs = xs_b.astype(jnp.float32)
    xg = xg_b.astype(jnp.float32)

    def mm(a_bf, w):
        return jnp.dot(a_bf, w.astype(bf), preferred_element_type=jnp.float32)

    ys = mm(xs_b, wl[:H, :])
    yg = mm(xg_b, wl[H:, :])

    h0 = jnp.maximum(mm(xg_b, w0a) + b0a, 0.0)
    h0 = mm(h0.astype(bf), w0b) + b0b
    ci0 = jnp.tanh(jnp.sum(h0 * xs, axis=-1, keepdims=True)) + 1.0

    h1 = jnp.maximum(mm(xs_b, w1a) + b1a, 0.0)
    h1 = mm(h1.astype(bf), w1b) + b1b
    ci1 = jnp.tanh(jnp.sum(h1 * xg, axis=-1, keepdims=True)) + 1.0

    return ci0 * ys + ci1 * yg + bl


if __name__ == "__main__":
    key = jax.random.PRNGKey(0)
    kp, k1, k2 = jax.random.split(key, 3)

    B, I = 2, 8   # small shapes: batch=2, seq=8, hidden=256 (fixed by module)
    x_seq = jax.random.normal(k1, (B, I, H), jnp.float32)
    x_graph = jax.random.normal(k2, (B, I, H), jnp.float32)

    params = init_params(kp)
    prepared = prepare_params(params)   # one-time bf16 weight conversion

    out = cross_interaction(x_seq, x_graph, prepared)
    out = jax.block_until_ready(out)
    assert out.shape == (B, I, H)

    # Tight check against the precision-matched reference (bf16 MXU operands,
    # f32 accumulation, commuted ci scale — exactly what the kernel does).
    ref_matched = reference_matched(x_seq, x_graph, params)
    assert jnp.allclose(out, ref_matched, atol=2e-3, rtol=2e-3), \
        "mismatch vs precision-matched JAX reference"

    # Statistical sanity check against the pure-f32 forward: bf16 operands
    # introduce ~1e-2-scale deviations, structural bugs would be O(1).
    ref_f32 = reference_f32(x_seq, x_graph, params)
    mad = jnp.mean(jnp.abs(out - ref_f32))
    assert mad < 2e-2, f"mean abs deviation vs f32 reference too large: {mad}"

    print("KERNEL_OK")
</pallas_src>

<mosaic_0001>
module attributes {stable_mosaic.version = 11 : i64} {
  func.func @cross_interaction_kernel(%arg0: i32, %arg1: memref<16x256xbf16, #tpu.memory_space<vmem>>, %arg2: memref<16x256xbf16, #tpu.memory_space<vmem>>, %arg3: memref<256x256xbf16, #tpu.memory_space<vmem>>, %arg4: memref<1x256xf32, #tpu.memory_space<vmem>>, %arg5: memref<256x256xbf16, #tpu.memory_space<vmem>>, %arg6: memref<1x256xf32, #tpu.memory_space<vmem>>, %arg7: memref<256x256xbf16, #tpu.memory_space<vmem>>, %arg8: memref<1x256xf32, #tpu.memory_space<vmem>>, %arg9: memref<256x256xbf16, #tpu.memory_space<vmem>>, %arg10: memref<1x256xf32, #tpu.memory_space<vmem>>, %arg11: memref<256x256xbf16, #tpu.memory_space<vmem>>, %arg12: memref<256x256xbf16, #tpu.memory_space<vmem>>, %arg13: memref<1x256xf32, #tpu.memory_space<vmem>>, %arg14: memref<16x256xf32, #tpu.memory_space<vmem>>) attributes {dimension_semantics = [#tpu.dimension_semantics<parallel>], iteration_bounds = array<i64: 1>, scalar_prefetch = 0 : i64, scratch_operands = 0 : i64, tpu.core_type = #tpu.core_type<tc>, window_params = [{transform_indices = @transform_0, window_bounds = array<i64: 16, 256>}, {transform_indices = @transform_1, window_bounds = array<i64: 16, 256>}, {pipeline_mode = #tpu.pipeline_mode<synchronous>, transform_indices = @transform_2, window_bounds = array<i64: 256, 256>}, {pipeline_mode = #tpu.pipeline_mode<synchronous>, transform_indices = @transform_3, window_bounds = array<i64: 1, 256>}, {pipeline_mode = #tpu.pipeline_mode<synchronous>, transform_indices = @transform_4, window_bounds = array<i64: 256, 256>}, {pipeline_mode = #tpu.pipeline_mode<synchronous>, transform_indices = @transform_5, window_bounds = array<i64: 1, 256>}, {pipeline_mode = #tpu.pipeline_mode<synchronous>, transform_indices = @transform_6, window_bounds = array<i64: 256, 256>}, {pipeline_mode = #tpu.pipeline_mode<synchronous>, transform_indices = @transform_7, window_bounds = array<i64: 1, 256>}, {pipeline_mode = #tpu.pipeline_mode<synchronous>, transform_indices = @transform_8, window_bounds = array<i64: 256, 256>}, {pipeline_mode = #tpu.pipeline_mode<synchronous>, transform_indices = @transform_9, window_bounds = array<i64: 1, 256>}, {pipeline_mode = #tpu.pipeline_mode<synchronous>, transform_indices = @transform_10, window_bounds = array<i64: 256, 256>}, {pipeline_mode = #tpu.pipeline_mode<synchronous>, transform_indices = @transform_11, window_bounds = array<i64: 256, 256>}, {pipeline_mode = #tpu.pipeline_mode<synchronous>, transform_indices = @transform_12, window_bounds = array<i64: 1, 256>}, {transform_indices = @transform_13, window_bounds = array<i64: 16, 256>}]} {
    %c0 = arith.constant 0 : index
    %c0_0 = arith.constant 0 : index
    %0 = vector.load %arg1[%c0, %c0_0] : memref<16x256xbf16, #tpu.memory_space<vmem>>, vector<16x256xbf16>
    %c0_1 = arith.constant 0 : index
    %c0_2 = arith.constant 0 : index
    %1 = vector.load %arg2[%c0_1, %c0_2] : memref<16x256xbf16, #tpu.memory_space<vmem>>, vector<16x256xbf16>
    %2 = arith.extf %0 : vector<16x256xbf16> to vector<16x256xf32>
    %3 = arith.extf %1 : vector<16x256xbf16> to vector<16x256xf32>
    %c0_3 = arith.constant 0 : index
    %c0_4 = arith.constant 0 : index
    %4 = vector.load %arg11[%c0_3, %c0_4] : memref<256x256xbf16, #tpu.memory_space<vmem>>, vector<256x256xbf16>
    %cst = arith.constant dense<0.000000e+00> : vector<16x256xf32>
    %5 = tpu.matmul %0, %4, %cst {dimension_numbers = #tpu.dot_dimension_numbers<[1], [0], [0], [1], [0, 0, 1, 1], [], []>} : vector<16x256xbf16>, vector<256x256xbf16>, vector<16x256xf32> -> vector<16x256xf32>
    %c0_5 = arith.constant 0 : index
    %c0_6 = arith.constant 0 : index
    %6 = vector.load %arg12[%c0_5, %c0_6] : memref<256x256xbf16, #tpu.memory_space<vmem>>, vector<256x256xbf16>
    %cst_7 = arith.constant dense<0.000000e+00> : vector<16x256xf32>
    %7 = tpu.matmul %1, %6, %cst_7 {dimension_numbers = #tpu.dot_dimension_numbers<[1], [0], [0], [1], [0, 0, 1, 1], [], []>} : vector<16x256xbf16>, vector<256x256xbf16>, vector<16x256xf32> -> vector<16x256xf32>
    %c0_8 = arith.constant 0 : index
    %c0_9 = arith.constant 0 : index
    %8 = vector.load %arg3[%c0_8, %c0_9] : memref<256x256xbf16, #tpu.memory_space<vmem>>, vector<256x256xbf16>
    %cst_10 = arith.constant dense<0.000000e+00> : vector<16x256xf32>
    %9 = tpu.matmul %1, %8, %cst_10 {dimension_numbers = #tpu.dot_dimension_numbers<[1], [0], [0], [1], [0, 0, 1, 1], [], []>} : vector<16x256xbf16>, vector<256x256xbf16>, vector<16x256xf32> -> vector<16x256xf32>
    %c0_11 = arith.constant 0 : index
    %c0_12 = arith.constant 0 : index
    %10 = vector.load %arg4[%c0_11, %c0_12] : memref<1x256xf32, #tpu.memory_space<vmem>>, vector<1x256xf32>
    %11 = vector.broadcast %10 : vector<1x256xf32> to vector<16x256xf32>
    %12 = arith.addf %9, %11 : vector<16x256xf32>
    %cst_13 = arith.constant 0.000000e+00 : f32
    %13 = vector.broadcast %cst_13 : f32 to vector<16x256xf32>
    %14 = arith.maximumf %12, %13 : vector<16x256xf32>
    %15 = arith.truncf %14 : vector<16x256xf32> to vector<16x256xbf16>
    %c0_14 = arith.constant 0 : index
    %c0_15 = arith.constant 0 : index
    %16 = vector.load %arg5[%c0_14, %c0_15] : memref<256x256xbf16, #tpu.memory_space<vmem>>, vector<256x256xbf16>
    %cst_16 = arith.constant dense<0.000000e+00> : vector<16x256xf32>
    %17 = tpu.matmul %15, %16, %cst_16 {dimension_numbers = #tpu.dot_dimension_numbers<[1], [0], [0], [1], [0, 0, 1, 1], [], []>} : vector<16x256xbf16>, vector<256x256xbf16>, vector<16x256xf32> -> vector<16x256xf32>
    %c0_17 = arith.constant 0 : index
    %c0_18 = arith.constant 0 : index
    %18 = vector.load %arg6[%c0_17, %c0_18] : memref<1x256xf32, #tpu.memory_space<vmem>>, vector<1x256xf32>
    %19 = vector.broadcast %18 : vector<1x256xf32> to vector<16x256xf32>
    %20 = arith.addf %17, %19 : vector<16x256xf32>
    %21 = arith.mulf %20, %2 : vector<16x256xf32>
    %cst_19 = arith.constant dense<0.000000e+00> : vector<16xf32>
    %22 = vector.multi_reduction <add>, %21, %cst_19 [1] : vector<16x256xf32> to vector<16xf32>
    %23 = vector.shape_cast %22 : vector<16xf32> to vector<16x1xf32>
    %24 = math.tanh %23 : vector<16x1xf32>
    %cst_20 = arith.constant 1.000000e+00 : f32
    %25 = vector.broadcast %cst_20 : f32 to vector<16x1xf32>
    %26 = arith.addf %24, %25 : vector<16x1xf32>
    %c0_21 = arith.constant 0 : index
    %c0_22 = arith.constant 0 : index
    %27 = vector.load %arg7[%c0_21, %c0_22] : memref<256x256xbf16, #tpu.memory_space<vmem>>, vector<256x256xbf16>
    %cst_23 = arith.constant dense<0.000000e+00> : vector<16x256xf32>
    %28 = tpu.matmul %0, %27, %cst_23 {dimension_numbers = #tpu.dot_dimension_numbers<[1], [0], [0], [1], [0, 0, 1, 1], [], []>} : vector<16x256xbf16>, vector<256x256xbf16>, vector<16x256xf32> -> vector<16x256xf32>
    %c0_24 = arith.constant 0 : index
    %c0_25 = arith.constant 0 : index
    %29 = vector.load %arg8[%c0_24, %c0_25] : memref<1x256xf32, #tpu.memory_space<vmem>>, vector<1x256xf32>
    %30 = vector.broadcast %29 : vector<1x256xf32> to vector<16x256xf32>
    %31 = arith.addf %28, %30 : vector<16x256xf32>
    %cst_26 = arith.constant 0.000000e+00 : f32
    %32 = vector.broadcast %cst_26 : f32 to vector<16x256xf32>
    %33 = arith.maximumf %31, %32 : vector<16x256xf32>
    %34 = arith.truncf %33 : vector<16x256xf32> to vector<16x256xbf16>
    %c0_27 = arith.constant 0 : index
    %c0_28 = arith.constant 0 : index
    %35 = vector.load %arg9[%c0_27, %c0_28] : memref<256x256xbf16, #tpu.memory_space<vmem>>, vector<256x256xbf16>
    %cst_29 = arith.constant dense<0.000000e+00> : vector<16x256xf32>
    %36 = tpu.matmul %34, %35, %cst_29 {dimension_numbers = #tpu.dot_dimension_numbers<[1], [0], [0], [1], [0, 0, 1, 1], [], []>} : vector<16x256xbf16>, vector<256x256xbf16>, vector<16x256xf32> -> vector<16x256xf32>
    %c0_30 = arith.constant 0 : index
    %c0_31 = arith.constant 0 : index
    %37 = vector.load %arg10[%c0_30, %c0_31] : memref<1x256xf32, #tpu.memory_space<vmem>>, vector<1x256xf32>
    %38 = vector.broadcast %37 : vector<1x256xf32> to vector<16x256xf32>
    %39 = arith.addf %36, %38 : vector<16x256xf32>
    %40 = arith.mulf %39, %3 : vector<16x256xf32>
    %cst_32 = arith.constant dense<0.000000e+00> : vector<16xf32>
    %41 = vector.multi_reduction <add>, %40, %cst_32 [1] : vector<16x256xf32> to vector<16xf32>
    %42 = vector.shape_cast %41 : vector<16xf32> to vector<16x1xf32>
    %43 = math.tanh %42 : vector<16x1xf32>
    %cst_33 = arith.constant 1.000000e+00 : f32
    %44 = vector.broadcast %cst_33 : f32 to vector<16x1xf32>
    %45 = arith.addf %43, %44 : vector<16x1xf32>
    %46 = vector.broadcast %26 : vector<16x1xf32> to vector<16x256xf32>
    %47 = arith.mulf %46, %5 : vector<16x256xf32>
    %48 = vector.broadcast %45 : vector<16x1xf32> to vector<16x256xf32>
    %49 = arith.mulf %48, %7 : vector<16x256xf32>
    %50 = arith.addf %47, %49 : vector<16x256xf32>
    %c0_34 = arith.constant 0 : index
    %c0_35 = arith.constant 0 : index
    %51 = vector.load %arg13[%c0_34, %c0_35] : memref<1x256xf32, #tpu.memory_space<vmem>>, vector<1x256xf32>
    %52 = vector.broadcast %51 : vector<1x256xf32> to vector<16x256xf32>
    %53 = arith.addf %50, %52 : vector<16x256xf32>
    %c0_36 = arith.constant 0 : index
    %c0_37 = arith.constant 0 : index
    %54 = vector.load %arg14[%c0_36, %c0_37] : memref<16x256xf32, #tpu.memory_space<vmem>>, vector<16x256xf32>
    tpu.vector_store %arg14[%c0_36, %c0_37], %53 {strides = array<i32>} : memref<16x256xf32, #tpu.memory_space<vmem>>, vector<16x256xf32>,
    return
  }
  func.func @transform_0(%arg0: i32) -> (i32, i32) {
    %c0_i32 = arith.constant 0 : i32
    %c0_i32_0 = arith.constant 0 : i32
    return %arg0, %c0_i32 : i32, i32
  }
  func.func @transform_1(%arg0: i32) -> (i32, i32) {
    %c0_i32 = arith.constant 0 : i32
    %c0_i32_0 = arith.constant 0 : i32
    return %arg0, %c0_i32 : i32, i32
  }
  func.func @transform_2(%arg0: i32) -> (i32, i32) {
    %c0_i32 = arith.constant 0 : i32
    %c0_i32_0 = arith.constant 0 : i32
    %c0_i32_1 = arith.constant 0 : i32
    return %c0_i32, %c0_i32_0 : i32, i32
  }
  func.func @transform_3(%arg0: i32) -> (i32, i32) {
    %c0_i32 = arith.constant 0 : i32
    %c0_i32_0 = arith.constant 0 : i32
    %c0_i32_1 = arith.constant 0 : i32
    return %c0_i32, %c0_i32_0 : i32, i32
  }
  func.func @transform_4(%arg0: i32) -> (i32, i32) {
    %c0_i32 = arith.constant 0 : i32
    %c0_i32_0 = arith.constant 0 : i32
    %c0_i32_1 = arith.constant 0 : i32
    return %c0_i32, %c0_i32_0 : i32, i32
  }
  func.func @transform_5(%arg0: i32) -> (i32, i32) {
    %c0_i32 = arith.constant 0 : i32
    %c0_i32_0 = arith.constant 0 : i32
    %c0_i32_1 = arith.constant 0 : i32
    return %c0_i32, %c0_i32_0 : i32, i32
  }
  func.func @transform_6(%arg0: i32) -> (i32, i32) {
    %c0_i32 = arith.constant 0 : i32
    %c0_i32_0 = arith.constant 0 : i32
    %c0_i32_1 = arith.constant 0 : i32
    return %c0_i32, %c0_i32_0 : i32, i32
  }
  func.func @transform_7(%arg0: i32) -> (i32, i32) {
    %c0_i32 = arith.constant 0 : i32
    %c0_i32_0 = arith.constant 0 : i32
    %c0_i32_1 = arith.constant 0 : i32
    return %c0_i32, %c0_i32_0 : i32, i32
  }
  func.func @transform_8(%arg0: i32) -> (i32, i32) {
    %c0_i32 = arith.constant 0 : i32
    %c0_i32_0 = arith.constant 0 : i32
    %c0_i32_1 = arith.constant 0 : i32
    return %c0_i32, %c0_i32_0 : i32, i32
  }
  func.func @transform_9(%arg0: i32) -> (i32, i32) {
    %c0_i32 = arith.constant 0 : i32
    %c0_i32_0 = arith.constant 0 : i32
    %c0_i32_1 = arith.constant 0 : i32
    return %c0_i32, %c0_i32_0 : i32, i32
  }
  func.func @transform_10(%arg0: i32) -> (i32, i32) {
    %c0_i32 = arith.constant 0 : i32
    %c0_i32_0 = arith.constant 0 : i32
    %c0_i32_1 = arith.constant 0 : i32
    return %c0_i32, %c0_i32_0 : i32, i32
  }
  func.func @transform_11(%arg0: i32) -> (i32, i32) {
    %c0_i32 = arith.constant 0 : i32
    %c0_i32_0 = arith.constant 0 : i32
    %c0_i32_1 = arith.constant 0 : i32
    return %c0_i32, %c0_i32_0 : i32, i32
  }
  func.func @transform_12(%arg0: i32) -> (i32, i32) {
    %c0_i32 = arith.constant 0 : i32
    %c0_i32_0 = arith.constant 0 : i32
    %c0_i32_1 = arith.constant 0 : i32
    return %c0_i32, %c0_i32_0 : i32, i32
  }
  func.func @transform_13(%arg0: i32) -> (i32, i32) {
    %c0_i32 = arith.constant 0 : i32
    %c0_i32_0 = arith.constant 0 : i32
    return %arg0, %c0_i32 : i32, i32
  }
}

</mosaic_0001>

<bundles_post_ra>
// kernel: tpu_custom_call.1
= control target key start
LH: loop header
LB: loop body
LE: loop exit
PB: predicated region body
PF: predicated region fallthrough
CT: control target
= control target key end

     0   :  { %18 = vsyncpa [#allocation3], 0  ;;  %s2772_s0 = inlined_call_operand.hbm [shape: bf16[16,256], index: 0, kind: input, shape index: {}]   ;;  %s2773_s1 = inlined_call_operand.hbm [shape: bf16[16,256], index: 1, kind: input, shape index: {}]   ;;  %s2774_s2 = inlined_call_operand.hbm [shape: bf16[256,256], index: 2, kind: input, shape index: {}]   ;;  %s2775_s3 = inlined_call_operand.vmem [shape: f32[1,256], index: 3, kind: input, shape index: {}]   ;;  %s2776_s4 = inlined_call_operand.hbm [shape: bf16[256,256], index: 4, kind: input, shape index: {}]   ;;  %s2777_s5 = inlined_call_operand.vmem [shape: f32[1,256], index: 5, kind: input, shape index: {}]   ;;  %s2778_s6 = inlined_call_operand.hbm [shape: bf16[256,256], index: 6, kind: input, shape index: {}]   ;;  %s2779_s7 = inlined_call_operand.vmem [shape: f32[1,256], index: 7, kind: input, shape index: {}]   ;;  %s2780_s8 = inlined_call_operand.hbm [shape: bf16[256,256], index: 8, kind: input, shape index: {}]   ;;  %s2781_s9 = inlined_call_operand.vmem [shape: f32[1,256], index: 9, kind: input, shape index: {}]   ;;  %s2782_s10 = inlined_call_operand.hbm [shape: bf16[256,256], index: 10, kind: input, shape index: {}]   ;;  %s2783_s11 = inlined_call_operand.hbm [shape: bf16[256,256], index: 11, kind: input, shape index: {}]   ;;  %s2784_s12 = inlined_call_operand.vmem [shape: f32[1,256], index: 12, kind: input, shape index: {}]   ;;  %s2785_s13 = inlined_call_operand.hbm [shape: f32[16,256], index: 13, kind: output, shape index: {}]  }
   0x1   :  { %19 = vsyncpa [#allocation6], 0 }
   0x2   :  { %20 = vsyncpa [#allocation9], 0 }
   0x3   :  { %21 = vsyncpa [#allocation12], 0 }
   0x4   :  { %22 = vsyncpa [#allocation15], 0 }
   0x5   :  { %23 = vsyncpa [#allocation4], 0  ;;  %s2460_s25 = smov [#allocation5]   ;;  %s2461_s27 = smov [#allocation8]  }
   0x6   :  { %s41_s26 = sshll.u32 %s2460_s25, 4  ;;  %s67_s28 = sshll.u32 %s2461_s27, 4  ;;  %s42_s26 = int_to_ptr.vmem [resolvable:$true] %s41_s26  ;;  %s2543_s28 = int_to_ptr.vmem [resolvable:$true] %s67_s28 }
   0x7   :  { %s2250_s14 = scalar_lea.hbm %s2773_s1, 256 }
   0x8   :  { %p2251_p0 = scmp.ne.s32.totalorder %s2773_s1, %s2250_s14  ;;  %p2254_p1 = scmp.lt.u32.totalorder %s2250_s14, %s2773_s1 }
   0xa   :  { %p2256_p2 = pnand %p2254_p1, %p2251_p0 }
   0xc   :  { %2259 = shalt.err (!%p2256_p2)
}
   0xd   :  { %s2260_s19 = scalar_lea.vmem %s42_s26, 256  ;;  %p2265_p4 = scmp.lt.s32.totalorder %s42_s26, %s42_s26 }
   0xe   :  { %p2261_p3 = scmp.ne.s32.totalorder %s42_s26, %s2260_s19  ;;  %p2266_p5 = scmp.lt.s32.totalorder %s2260_s19, %s2260_s19 }
  0x10   :  { %p2267_p6 = por %p2266_p5, %p2265_p4 }
  0x12   :  { %p2268_p7 = pnand %p2267_p6, %p2261_p3 }
  0x14   :  { %2271 = shalt.err (!%p2268_p7)
}
  0x15   :  { %s2462_s20 = smov 128   ;;  %s2463_s21 = smov 8  }
  0x16   :  { %47 = dma.hbm_to_vmem [thread:$0]  %s2773_s1, 256, %s42_s26, [#allocation6], %s2462_s20, %s2462_s20, %s2463_s21  }
  0x17   :  { %s2272_s27 = scalar_lea.hbm %s2776_s4, 4096 }
  0x18   :  { %p2273_p8 = scmp.ne.s32.totalorder %s2776_s4, %s2272_s27  ;;  %p2276_p9 = scmp.lt.u32.totalorder %s2272_s27, %s2776_s4 }
  0x1a   :  { %p2278_p10 = pnand %p2276_p9, %p2273_p8 }
  0x1c   :  { %2281 = shalt.err (!%p2278_p10)
}
  0x1d   :  { %s2282_s16 = scalar_lea.vmem %s2543_s28, 4096  ;;  %p2287_p12 = scmp.lt.s32.totalorder %s2543_s28, %s2543_s28 }
  0x1e   :  { %p2283_p11 = scmp.ne.s32.totalorder %s2543_s28, %s2282_s16  ;;  %p2288_p13 = scmp.lt.s32.totalorder %s2282_s16, %s2282_s16 }
  0x20   :  { %p2289_p0 = por %p2288_p13, %p2287_p12 }
  0x22   :  { %p2290_p1 = pnand %p2289_p0, %p2283_p11 }
  0x24   :  { %2293 = shalt.err (!%p2290_p1)
}
  0x25   :  { %73 = dma.hbm_to_vmem [thread:$0]  %s2776_s4, 4096, %s2543_s28, [#allocation9], %s2462_s20, %s2462_s20, %s2463_s21  }
  0x26   :  { %s2464_s17 = smov [#allocation11]   ;;  %s2465_s19 = smov [#allocation2]  }
  0x27   :  { %s95_s18 = sshll.u32 %s2464_s17, 4  ;;  %s29_s22 = sshll.u32 %s2465_s19, 4  ;;  %s96_s18 = int_to_ptr.vmem [resolvable:$true] %s95_s18  ;;  %s2580_s22 = int_to_ptr.vmem [resolvable:$true] %s29_s22 }
  0x28   :  { %s2294_s25 = scalar_lea.hbm %s2780_s8, 4096 }
  0x29   :  { %p2295_p2 = scmp.ne.s32.totalorder %s2780_s8, %s2294_s25  ;;  %p2298_p3 = scmp.lt.u32.totalorder %s2294_s25, %s2780_s8 }
  0x2b   :  { %p2300_p4 = pnand %p2298_p3, %p2295_p2 }
  0x2d   :  { %2303 = shalt.err (!%p2300_p4)
}
  0x2e   :  { %s2304_s4 = scalar_lea.vmem %s96_s18, 4096  ;;  %p2309_p6 = scmp.lt.s32.totalorder %s96_s18, %s96_s18 }
  0x2f   :  { %p2305_p5 = scmp.ne.s32.totalorder %s96_s18, %s2304_s4  ;;  %p2310_p7 = scmp.lt.s32.totalorder %s2304_s4, %s2304_s4 }
  0x31   :  { %p2311_p8 = por %p2310_p7, %p2309_p6 }
  0x33   :  { %p2312_p9 = pnand %p2311_p8, %p2305_p5 }
  0x35   :  { %2315 = shalt.err (!%p2312_p9)
}
  0x36   :  { %101 = dma.hbm_to_vmem [thread:$0]  %s2780_s8, 4096, %s96_s18, [#allocation12], %s2462_s20, %s2462_s20, %s2463_s21  }
  0x37   :  { %s2316_s26 = scalar_lea.hbm %s2772_s0, 256 }
  0x38   :  { %p2317_p10 = scmp.ne.s32.totalorder %s2772_s0, %s2316_s26  ;;  %p2320_p11 = scmp.lt.u32.totalorder %s2316_s26, %s2772_s0 }
  0x3a   :  { %p2322_p12 = pnand %p2320_p11, %p2317_p10 }
  0x3c   :  { %2325 = shalt.err (!%p2322_p12)
}
  0x3d   :  { %s2326_s25 = scalar_lea.vmem %s2580_s22, 256  ;;  %p2331_p0 = scmp.lt.s32.totalorder %s2580_s22, %s2580_s22 }
  0x3e   :  { %p2327_p13 = scmp.ne.s32.totalorder %s2580_s22, %s2326_s25  ;;  %p2332_p1 = scmp.lt.s32.totalorder %s2326_s25, %s2326_s25 }
  0x40   :  { %p2333_p2 = por %p2332_p1, %p2331_p0 }
  0x42   :  { %p2334_p3 = pnand %p2333_p2, %p2327_p13 }
  0x44   :  { %2337 = shalt.err (!%p2334_p3)
}
  0x45   :  { %35 = dma.hbm_to_vmem [thread:$0]  %s2772_s0, 256, %s2580_s22, [#allocation3], %s2462_s20, %s2462_s20, %s2463_s21  }
  0x46   :  { %s2466_s27 = smov [#allocation7]   ;;  %s2467_s30 = smov [#allocation10]  }
  0x47   :  { %s53_s29 = sshll.u32 %s2466_s27, 4  ;;  %s81_s14 = sshll.u32 %s2467_s30, 4  ;;  %s54_s29 = int_to_ptr.vmem [resolvable:$true] %s53_s29  ;;  %s2617_s14 = int_to_ptr.vmem [resolvable:$true] %s81_s14 }
  0x48   :  { %s2338_s15 = scalar_lea.hbm %s2774_s2, 4096 }
  0x49   :  { %p2339_p4 = scmp.ne.s32.totalorder %s2774_s2, %s2338_s15  ;;  %p2342_p5 = scmp.lt.u32.totalorder %s2338_s15, %s2774_s2 }
  0x4b   :  { %p2344_p6 = pnand %p2342_p5, %p2339_p4 }
  0x4d   :  { %2347 = shalt.err (!%p2344_p6)
}
  0x4e   :  { %s2348_s0 = scalar_lea.vmem %s54_s29, 4096  ;;  %p2353_p8 = scmp.lt.s32.totalorder %s54_s29, %s54_s29 }
  0x4f   :  { %p2349_p7 = scmp.ne.s32.totalorder %s54_s29, %s2348_s0  ;;  %p2354_p9 = scmp.lt.s32.totalorder %s2348_s0, %s2348_s0 }
  0x51   :  { %p2355_p10 = por %p2354_p9, %p2353_p8 }
  0x53   :  { %p2356_p11 = pnand %p2355_p10, %p2349_p7 }
  0x55   :  { %2359 = shalt.err (!%p2356_p11)
}
  0x56   :  { %59 = dma.hbm_to_vmem [thread:$0]  %s2774_s2, 4096, %s54_s29, [#allocation6], %s2462_s20, %s2462_s20, %s2463_s21  }
  0x57   :  { %s2360_s25 = scalar_lea.hbm %s2778_s6, 4096 }
  0x58   :  { %p2361_p12 = scmp.ne.s32.totalorder %s2778_s6, %s2360_s25  ;;  %p2364_p13 = scmp.lt.u32.totalorder %s2360_s25, %s2778_s6 }
  0x5a   :  { %p2366_p0 = pnand %p2364_p13, %p2361_p12 }
  0x5c   :  { %2369 = shalt.err (!%p2366_p0)
}
  0x5d   :  { %s2370_s4 = scalar_lea.vmem %s2617_s14, 4096  ;;  %p2375_p2 = scmp.lt.s32.totalorder %s2617_s14, %s2617_s14 }
  0x5e   :  { %p2371_p1 = scmp.ne.s32.totalorder %s2617_s14, %s2370_s4  ;;  %p2376_p3 = scmp.lt.s32.totalorder %s2370_s4, %s2370_s4 }
  0x60   :  { %p2377_p4 = por %p2376_p3, %p2375_p2 }
  0x62   :  { %p2378_p5 = pnand %p2377_p4, %p2371_p1 }
  0x64   :  { %2381 = shalt.err (!%p2378_p5)
}
  0x65   :  { %87 = dma.hbm_to_vmem [thread:$0]  %s2778_s6, 4096, %s2617_s14, [#allocation9], %s2462_s20, %s2462_s20, %s2463_s21  }
  0x66   :  { %s2468_s28 = smov [#allocation13]   ;;  %s2469_s16 = smov [#allocation14]  }
  0x67   :  { %s109_s15 = sshll.u32 %s2468_s28, 4  ;;  %s121_s1 = sshll.u32 %s2469_s16, 4  ;;  %s110_s15 = int_to_ptr.vmem [resolvable:$true] %s109_s15  ;;  %s2654_s1 = int_to_ptr.vmem [resolvable:$true] %s121_s1 }
  0x68   :  { %s2382_s0 = scalar_lea.hbm %s2782_s10, 4096 }
  0x69   :  { %p2383_p6 = scmp.ne.s32.totalorder %s2782_s10, %s2382_s0  ;;  %p2386_p7 = scmp.lt.u32.totalorder %s2382_s0, %s2782_s10 }
  0x6b   :  { %p2388_p8 = pnand %p2386_p7, %p2383_p6 }
  0x6d   :  { %2391 = shalt.err (!%p2388_p8)
}
  0x6e   :  { %s2392_s6 = scalar_lea.vmem %s110_s15, 4096  ;;  %p2397_p10 = scmp.lt.s32.totalorder %s110_s15, %s110_s15 }
  0x6f   :  { %p2393_p9 = scmp.ne.s32.totalorder %s110_s15, %s2392_s6  ;;  %p2398_p11 = scmp.lt.s32.totalorder %s2392_s6, %s2392_s6 }
  0x71   :  { %p2399_p12 = por %p2398_p11, %p2397_p10 }
  0x73   :  { %p2400_p13 = pnand %p2399_p12, %p2393_p9 }
  0x75   :  { %2403 = shalt.err (!%p2400_p13)
}
  0x76   :  { %115 = dma.hbm_to_vmem [thread:$0]  %s2782_s10, 4096, %s110_s15, [#allocation12], %s2462_s20, %s2462_s20, %s2463_s21  }
  0x77   :  { %s2404_s27 = scalar_lea.hbm %s2783_s11, 4096 }
  0x78   :  { %p2405_p0 = scmp.ne.s32.totalorder %s2783_s11, %s2404_s27  ;;  %p2408_p1 = scmp.lt.u32.totalorder %s2404_s27, %s2783_s11 }
  0x7a   :  { %p2410_p2 = pnand %p2408_p1, %p2405_p0 }
  0x7c   :  { %2413 = shalt.err (!%p2410_p2)
}
  0x7d   :  { %s2414_s28 = scalar_lea.vmem %s2654_s1, 4096  ;;  %p2419_p4 = scmp.lt.s32.totalorder %s2654_s1, %s2654_s1 }
  0x7e   :  { %p2415_p3 = scmp.ne.s32.totalorder %s2654_s1, %s2414_s28  ;;  %p2420_p5 = scmp.lt.s32.totalorder %s2414_s28, %s2414_s28 }
  0x80   :  { %p2421_p6 = por %p2420_p5, %p2419_p4 }
  0x82   :  { %p2422_p7 = pnand %p2421_p6, %p2415_p3 }
  0x84   :  { %2425 = shalt.err (!%p2422_p7)
}
  0x85   :  { %127 = dma.hbm_to_vmem [thread:$0]  %s2783_s11, 4096, %s2654_s1, [#allocation15], %s2462_s20, %s2462_s20, %s2463_s21  }
  0x86   :  { %2448 = dma.done.wait [#allocation3], 256  }
  0x87   :  { %2449 = vsyncadd [#allocation3], 4294967040 }
  0x88   :  { %2450 = dma.done.wait [#allocation6], 4352  }
  0x89   :  { %2451 = vsyncadd [#allocation6], 4294962944 }
  0x8a   :  { %2452 = dma.done.wait [#allocation9], 8192  }
  0x8b   :  { %2453 = vsyncadd [#allocation9], 4294959104 }
  0x8c   :  { %2454 = dma.done.wait [#allocation12], 8192  }
  0x8d   :  { %2455 = vsyncadd [#allocation12], 4294959104 }
  0x8e   :  { %2456 = dma.done.wait [#allocation15], 4096  }
  0x8f   :  { %2457 = vsyncadd [#allocation15], 4294963200  ;;  %v1946_v0 = vld [vmem:[#allocation13 + $0x4] ss:$8 sps:$4 sm:$0xff]   ;;  %v1948_v1 = vld [vmem:[#allocation13] ss:$8 sps:$4 sm:$0xff]  }
  0x90   :  { %368 = vmatprep.subr.bf16.mxu0 %v1946_v0  ;;  %v1949_v2 = vld [vmem:[#allocation13 + $0x14] ss:$8 sps:$4 sm:$0xff]   ;;  %v1951_v3 = vld [vmem:[#allocation13 + $0x10] ss:$8 sps:$4 sm:$0xff]   ;;  %v1952_v4 = vld [vmem:[#allocation13 + $0x24] ss:$8 sps:$4 sm:$0xff]  }
  0x91   :  { %369 = vmatpush1.bf16.msra.mxu0 %v1948_v1  ;;  %v1954_v5 = vld [vmem:[#allocation13 + $0x20] ss:$8 sps:$4 sm:$0xff]   ;;  %v1955_v6 = vld [vmem:[#allocation13 + $0x34] ss:$8 sps:$4 sm:$0xff]   ;;  %v1957_v7 = vld [vmem:[#allocation13 + $0x30] ss:$8 sps:$4 sm:$0xff]  }
  0x92   :  { %370 = vmatprep.subr.bf16.mxu0 %v1949_v2  ;;  %v1958_v8 = vld [vmem:[#allocation13 + $0x44] ss:$8 sps:$4 sm:$0xff]   ;;  %v1960_v9 = vld [vmem:[#allocation13 + $0x40] ss:$8 sps:$4 sm:$0xff]   ;;  %v1961_v10 = vld [vmem:[#allocation13 + $0x54] ss:$8 sps:$4 sm:$0xff]  }
  0x93   :  { %v1963_v11 = vld [vmem:[#allocation13 + $0x50] ss:$8 sps:$4 sm:$0xff]   ;;  %v1964_v12 = vld [vmem:[#allocation13 + $0x64] ss:$8 sps:$4 sm:$0xff]   ;;  %v1966_v16 = vld [vmem:[#allocation13 + $0x60] ss:$8 sps:$4 sm:$0xff]  }
  0x94   :  { %v154_v13 = vld [vmem:[#allocation2] sm:$0xff]  ;;  %v155_v14 = vld [vmem:[#allocation2 + $0x8] sm:$0xff]  ;;  %v1967_v17 = vld [vmem:[#allocation13 + $0x74] ss:$8 sps:$4 sm:$0xff]  }
  0x95   :  { %371 = vmatpush1.bf16.msra.mxu0 %v1951_v3  ;;  %v2691_v15 = vcombine.high %v154_v13, %v155_v14  ;;  %v1969_v18 = vld [vmem:[#allocation13 + $0x70] ss:$8 sps:$4 sm:$0xff]   ;;  %v1970_v19 = vld [vmem:[#allocation13 + $0x84] ss:$8 sps:$4 sm:$0xff]   ;;  %v1972_v20 = vld [vmem:[#allocation13 + $0x80] ss:$8 sps:$4 sm:$0xff]   ;;  %v2700_v39 = vcombine.low %v154_v13, %v155_v14 }
  0x96   :  { %372 = vmatprep.subr.bf16.mxu0 %v1952_v4  ;;  %v1973_v21 = vld [vmem:[#allocation13 + $0x94] ss:$8 sps:$4 sm:$0xff]   ;;  %v1975_v22 = vld [vmem:[#allocation13 + $0x90] ss:$8 sps:$4 sm:$0xff]   ;;  %v1976_v23 = vld [vmem:[#allocation13 + $0xa4] ss:$8 sps:$4 sm:$0xff]  }
  0x97   :  { %400 = vmatprep.mubr.bf16.mxu0 %v2691_v15  ;;  %v1978_v24 = vld [vmem:[#allocation13 + $0xa0] ss:$8 sps:$4 sm:$0xff]   ;;  %v1979_v25 = vld [vmem:[#allocation13 + $0xb4] ss:$8 sps:$4 sm:$0xff]   ;;  %v1981_v26 = vld [vmem:[#allocation13 + $0xb0] ss:$8 sps:$4 sm:$0xff]  }
  0x98   :  { %v2694_v27 = vld [vmem:[#allocation5] sm:$0xff]  ;;  %v2696_v28 = vld [vmem:[#allocation5 + $0x8] sm:$0xff]  ;;  %v1982_v29 = vld [vmem:[#allocation13 + $0xc4] ss:$8 sps:$4 sm:$0xff]  }
  0x99   :  { %373 = vmatpush1.bf16.msra.mxu0 %v1954_v5  ;;  %v1772_v30 = vcombine.high %v2694_v27, %v2696_v28  ;;  %v1984_v31 = vld [vmem:[#allocation13 + $0xc0] ss:$8 sps:$4 sm:$0xff]   ;;  %v1985_v32 = vld [vmem:[#allocation13 + $0xd4] ss:$8 sps:$4 sm:$0xff]   ;;  %v1987_v33 = vld [vmem:[#allocation13 + $0xd0] ss:$8 sps:$4 sm:$0xff]  }
  0x9a   :  { %374 = vmatprep.subr.bf16.mxu0 %v1955_v6  ;;  %v1988_v34 = vld [vmem:[#allocation13 + $0xe4] ss:$8 sps:$4 sm:$0xff]   ;;  %v1990_v35 = vld [vmem:[#allocation13 + $0xe0] ss:$8 sps:$4 sm:$0xff]   ;;  %v1991_v36 = vld [vmem:[#allocation13 + $0xf4] ss:$8 sps:$4 sm:$0xff]  }
  0x9b   :  { %645 = vmatprep.mubr.bf16.mxu1 %v1772_v30  ;;  %v1993_v37 = vld [vmem:[#allocation13 + $0xf0] ss:$8 sps:$4 sm:$0xff]   ;;  %v1998_v38 = vld [vmem:[#allocation7 + $0x4] ss:$8 sps:$4 sm:$0xff]   ;;  %v1996_v40 = vld [vmem:[#allocation7] ss:$8 sps:$4 sm:$0xff]  }
  0x9c   :  { %v2001_v41 = vld [vmem:[#allocation7 + $0x14] ss:$8 sps:$4 sm:$0xff]   ;;  %v2094_v42 = vld [vmem:[#allocation14 + $0x4] ss:$8 sps:$4 sm:$0xff]   ;;  %v2096_v43 = vld [vmem:[#allocation14] ss:$8 sps:$4 sm:$0xff]  }
  0x9d   :  { %375 = vmatpush1.bf16.msra.mxu0 %v1957_v7  ;;  %v1999_v44 = vld [vmem:[#allocation7 + $0x10] ss:$8 sps:$4 sm:$0xff]   ;;  %v2097_v45 = vld [vmem:[#allocation14 + $0x14] ss:$8 sps:$4 sm:$0xff]   ;;  %v2004_v46 = vld [vmem:[#allocation7 + $0x24] ss:$8 sps:$4 sm:$0xff]   ;;  %613 = vmatprep.subr.bf16.mxu1 %v2094_v42 }
  0x9e   :  { %376 = vmatprep.subr.bf16.mxu0 %v1958_v8  ;;  %614 = vmatpush1.bf16.msra.mxu1 %v2096_v43  ;;  %v2099_v47 = vld [vmem:[#allocation14 + $0x10] ss:$8 sps:$4 sm:$0xff]   ;;  %v2100_v48 = vld [vmem:[#allocation14 + $0x24] ss:$8 sps:$4 sm:$0xff]   ;;  %v2002_v49 = vld [vmem:[#allocation7 + $0x20] ss:$8 sps:$4 sm:$0xff]  }
  0x9f   :  { %615 = vmatprep.subr.bf16.mxu1 %v2097_v45  ;;  %v2007_v50 = vld [vmem:[#allocation7 + $0x34] ss:$8 sps:$4 sm:$0xff]   ;;  %v2102_v51 = vld [vmem:[#allocation14 + $0x20] ss:$8 sps:$4 sm:$0xff]   ;;  %v2005_v53 = vld [vmem:[#allocation7 + $0x30] ss:$8 sps:$4 sm:$0xff]  }
  0xa0   :  { %v2103_v52 = vld [vmem:[#allocation14 + $0x34] ss:$8 sps:$4 sm:$0xff]   ;;  %v2010_v54 = vld [vmem:[#allocation7 + $0x44] ss:$8 sps:$4 sm:$0xff]   ;;  %v2105_v55 = vld [vmem:[#allocation14 + $0x30] ss:$8 sps:$4 sm:$0xff]  }
  0xa1   :  { %377 = vmatpush1.bf16.msra.mxu0 %v1960_v9  ;;  %v2106_v56 = vld [vmem:[#allocation14 + $0x44] ss:$8 sps:$4 sm:$0xff]   ;;  %v2008_v57 = vld [vmem:[#allocation7 + $0x40] ss:$8 sps:$4 sm:$0xff]   ;;  %v2013_v58 = vld [vmem:[#allocation7 + $0x54] ss:$8 sps:$4 sm:$0xff]  }
  0xa2   :  { %378 = vmatprep.subr.bf16.mxu0 %v1961_v10  ;;  %616 = vmatpush1.bf16.msra.mxu1 %v2099_v47  ;;  %v2108_v59 = vld [vmem:[#allocation14 + $0x40] ss:$8 sps:$4 sm:$0xff]   ;;  %v2011_v60 = vld [vmem:[#allocation7 + $0x50] ss:$8 sps:$4 sm:$0xff]   ;;  %v2109_v61 = vld [vmem:[#allocation14 + $0x54] ss:$8 sps:$4 sm:$0xff]  }
  0xa3   :  { %617 = vmatprep.subr.bf16.mxu1 %v2100_v48  ;;  %v2016_v62 = vld [vmem:[#allocation7 + $0x64] ss:$8 sps:$4 sm:$0xff]   ;;  %v2111_v63 = vld [vmem:[#allocation14 + $0x50] ss:$8 sps:$4 sm:$0xff]   ;;  %v2014_v1 = vld [vmem:[#allocation7 + $0x60] ss:$8 sps:$4 sm:$0xff]  }
  0xa4   :  { %v2112_v0 = vld [vmem:[#allocation14 + $0x64] ss:$8 sps:$4 sm:$0xff]   ;;  %v2019_v2 = vld [vmem:[#allocation7 + $0x74] ss:$8 sps:$4 sm:$0xff]   ;;  %v2114_v3 = vld [vmem:[#allocation14 + $0x60] ss:$8 sps:$4 sm:$0xff]  }
  0xa5   :  { %379 = vmatpush1.bf16.msra.mxu0 %v1963_v11  ;;  %v2115_v4 = vld [vmem:[#allocation14 + $0x74] ss:$8 sps:$4 sm:$0xff]   ;;  %v2017_v5 = vld [vmem:[#allocation7 + $0x70] ss:$8 sps:$4 sm:$0xff]   ;;  %v2022_v6 = vld [vmem:[#allocation7 + $0x84] ss:$8 sps:$4 sm:$0xff]  }
  0xa6   :  { %380 = vmatprep.subr.bf16.mxu0 %v1964_v12  ;;  %618 = vmatpush1.bf16.msra.mxu1 %v2102_v51  ;;  %v2117_v7 = vld [vmem:[#allocation14 + $0x70] ss:$8 sps:$4 sm:$0xff]   ;;  %v2118_v8 = vld [vmem:[#allocation14 + $0x84] ss:$8 sps:$4 sm:$0xff]   ;;  %v2020_v9 = vld [vmem:[#allocation7 + $0x80] ss:$8 sps:$4 sm:$0xff]  }
  0xa7   :  { %619 = vmatprep.subr.bf16.mxu1 %v2103_v52  ;;  %v2025_v10 = vld [vmem:[#allocation7 + $0x94] ss:$8 sps:$4 sm:$0xff]   ;;  %v2120_v11 = vld [vmem:[#allocation14 + $0x80] ss:$8 sps:$4 sm:$0xff]   ;;  %v2023_v13 = vld [vmem:[#allocation7 + $0x90] ss:$8 sps:$4 sm:$0xff]  }
  0xa8   :  { %v2121_v12 = vld [vmem:[#allocation14 + $0x94] ss:$8 sps:$4 sm:$0xff]   ;;  %v2028_v14 = vld [vmem:[#allocation7 + $0xa4] ss:$8 sps:$4 sm:$0xff]   ;;  %v2049_v43 = vld [vmem:[#allocation10 + $0x10] ss:$8 sps:$4 sm:$0xff]  }
  0xa9   :  { %381 = vmatpush1.bf16.msra.mxu0 %v1966_v16  ;;  %v2123_v16 = vld [vmem:[#allocation14 + $0x90] ss:$8 sps:$4 sm:$0xff]   ;;  %v2051_v42 = vld [vmem:[#allocation10 + $0x14] ss:$8 sps:$4 sm:$0xff]   ;;  %v2052_v45 = vld [vmem:[#allocation10 + $0x20] ss:$8 sps:$4 sm:$0xff]  }
  0xaa   :  { %382 = vmatprep.subr.bf16.mxu0 %v1967_v17  ;;  %620 = vmatpush1.bf16.msra.mxu1 %v2105_v55  ;;  %v2124_v17 = vld [vmem:[#allocation14 + $0xa4] ss:$8 sps:$4 sm:$0xff]   ;;  %v2055_v47 = vld [vmem:[#allocation10 + $0x30] ss:$8 sps:$4 sm:$0xff]   ;;  %v2064_v52 = vld [vmem:[#allocation10 + $0x60] ss:$8 sps:$4 sm:$0xff]  }
  0xab   :  { %621 = vmatprep.subr.bf16.mxu1 %v2106_v56  ;;  %v2060_v48 = vld [vmem:[#allocation10 + $0x44] ss:$8 sps:$4 sm:$0xff]   ;;  %v2141_v55 = vld [vmem:[#allocation14 + $0xf0] ss:$8 sps:$4 sm:$0xff]  }
  0xac   :  { %v2136_v51 = vld [vmem:[#allocation14 + $0xe4] ss:$8 sps:$4 sm:$0xff]  }
  0xad   :  { %383 = vmatpush1.bf16.msra.mxu0 %v1969_v18  ;;  %v2026_v18 = vld [vmem:[#allocation7 + $0xa0] ss:$8 sps:$4 sm:$0xff]   ;;  %v2144_v56 = vld [vmem:[#allocation8 + $0x4] ss:$8 sps:$4 sm:$0xff]  }
  0xae   :  { %384 = vmatprep.subr.bf16.mxu0 %v1970_v19  ;;  %622 = vmatpush1.bf16.msra.mxu1 %v2108_v59  ;;  %v2031_v19 = vld [vmem:[#allocation7 + $0xb4] ss:$8 sps:$4 sm:$0xff]   ;;  %v2072_v59 = vld [vmem:[#allocation10 + $0x84] ss:$8 sps:$4 sm:$0xff]  }
  0xaf   :  { %623 = vmatprep.subr.bf16.mxu1 %v2109_v61  ;;  %v2070_v61 = vld [vmem:[#allocation10 + $0x80] ss:$8 sps:$4 sm:$0xff]  }
  0xb1   :  { %385 = vmatpush1.bf16.msra.mxu0 %v1972_v20  ;;  %v2126_v20 = vld [vmem:[#allocation14 + $0xa0] ss:$8 sps:$4 sm:$0xff]  }
  0xb2   :  { %386 = vmatprep.subr.bf16.mxu0 %v1973_v21  ;;  %624 = vmatpush1.bf16.msra.mxu1 %v2111_v63  ;;  %v2127_v21 = vld [vmem:[#allocation14 + $0xb4] ss:$8 sps:$4 sm:$0xff]  }
  0xb3   :  { %625 = vmatprep.subr.bf16.mxu1 %v2112_v0  ;;  %v2075_v63 = vld [vmem:[#allocation10 + $0x94] ss:$8 sps:$4 sm:$0xff]   ;;  %v2150_v0 = vld [vmem:[#allocation8 + $0x24] ss:$8 sps:$4 sm:$0xff]  }
  0xb5   :  { %387 = vmatpush1.bf16.msra.mxu0 %v1975_v22  ;;  %v2029_v22 = vld [vmem:[#allocation7 + $0xb0] ss:$8 sps:$4 sm:$0xff]  }
  0xb6   :  { %388 = vmatprep.subr.bf16.mxu0 %v1976_v23  ;;  %626 = vmatpush1.bf16.msra.mxu1 %v2114_v3  ;;  %v2034_v23 = vld [vmem:[#allocation7 + $0xc4] ss:$8 sps:$4 sm:$0xff]  }
  0xb7   :  { %627 = vmatprep.subr.bf16.mxu1 %v2115_v4  ;;  %v2078_v3 = vld [vmem:[#allocation10 + $0xa4] ss:$8 sps:$4 sm:$0xff]   ;;  %v2153_v4 = vld [vmem:[#allocation8 + $0x34] ss:$8 sps:$4 sm:$0xff]  }
  0xb9   :  { %389 = vmatpush1.bf16.msra.mxu0 %v1978_v24  ;;  %v2129_v24 = vld [vmem:[#allocation14 + $0xb0] ss:$8 sps:$4 sm:$0xff]  }
  0xba   :  { %390 = vmatprep.subr.bf16.mxu0 %v1979_v25  ;;  %628 = vmatpush1.bf16.msra.mxu1 %v2117_v7  ;;  %v2130_v25 = vld [vmem:[#allocation14 + $0xc4] ss:$8 sps:$4 sm:$0xff]   ;;  %v2081_v7 = vld [vmem:[#allocation10 + $0xb4] ss:$8 sps:$4 sm:$0xff]  }
  0xbb   :  { %629 = vmatprep.subr.bf16.mxu1 %v2118_v8  ;;  %v2156_v8 = vld [vmem:[#allocation8 + $0x44] ss:$8 sps:$4 sm:$0xff]  }
  0xbd   :  { %391 = vmatpush1.bf16.msra.mxu0 %v1981_v26  ;;  %v2032_v26 = vld [vmem:[#allocation7 + $0xc0] ss:$8 sps:$4 sm:$0xff]  }
  0xbe   :  { %392 = vmatprep.subr.bf16.mxu0 %v1982_v29  ;;  %630 = vmatpush1.bf16.msra.mxu1 %v2120_v11  ;;  %v2037_v29 = vld [vmem:[#allocation7 + $0xd4] ss:$8 sps:$4 sm:$0xff]   ;;  %v2084_v11 = vld [vmem:[#allocation10 + $0xc4] ss:$8 sps:$4 sm:$0xff]  }
  0xbf   :  { %631 = vmatprep.subr.bf16.mxu1 %v2121_v12  ;;  %v2159_v12 = vld [vmem:[#allocation8 + $0x54] ss:$8 sps:$4 sm:$0xff]  }
  0xc1   :  { %393 = vmatpush1.bf16.msra.mxu0 %v1984_v31  ;;  %v2133_v31 = vld [vmem:[#allocation14 + $0xd4] ss:$8 sps:$4 sm:$0xff]  }
  0xc2   :  { %394 = vmatprep.subr.bf16.mxu0 %v1985_v32  ;;  %632 = vmatpush1.bf16.msra.mxu1 %v2123_v16  ;;  %v2035_v32 = vld [vmem:[#allocation7 + $0xd0] ss:$8 sps:$4 sm:$0xff]   ;;  %v2087_v16 = vld [vmem:[#allocation10 + $0xd4] ss:$8 sps:$4 sm:$0xff]  }
  0xc3   :  { %633 = vmatprep.subr.bf16.mxu1 %v2124_v17  ;;  %v2162_v17 = vld [vmem:[#allocation8 + $0x64] ss:$8 sps:$4 sm:$0xff]  }
  0xc5   :  { %395 = vmatpush1.bf16.msra.mxu0 %v1987_v33  ;;  %v2040_v33 = vld [vmem:[#allocation7 + $0xe4] ss:$8 sps:$4 sm:$0xff]  }
  0xc6   :  { %396 = vmatprep.subr.bf16.mxu0 %v1988_v34  ;;  %634 = vmatpush1.bf16.msra.mxu1 %v2126_v20  ;;  %v2135_v34 = vld [vmem:[#allocation14 + $0xd0] ss:$8 sps:$4 sm:$0xff]   ;;  %v2090_v20 = vld [vmem:[#allocation10 + $0xe4] ss:$8 sps:$4 sm:$0xff]  }
  0xc7   :  { %635 = vmatprep.subr.bf16.mxu1 %v2127_v21  ;;  %v2165_v21 = vld [vmem:[#allocation8 + $0x74] ss:$8 sps:$4 sm:$0xff]  }
  0xc9   :  { %397 = vmatpush1.bf16.msra.mxu0 %v1990_v35  ;;  %v2038_v35 = vld [vmem:[#allocation7 + $0xe0] ss:$8 sps:$4 sm:$0xff]  }
  0xca   :  { %398 = vmatprep.subr.bf16.mxu0 %v1991_v36  ;;  %636 = vmatpush1.bf16.msra.mxu1 %v2129_v24  ;;  %v2043_v36 = vld [vmem:[#allocation7 + $0xf4] ss:$8 sps:$4 sm:$0xff]  }
  0xcb   :  { %637 = vmatprep.subr.bf16.mxu1 %v2130_v25  ;;  %v2093_v24 = vld [vmem:[#allocation10 + $0xf4] ss:$8 sps:$4 sm:$0xff]   ;;  %v2168_v25 = vld [vmem:[#allocation8 + $0x84] ss:$8 sps:$4 sm:$0xff]  }
  0xcd   :  { %399 = vmatpush1.bf16.msra.mxu0 %v1993_v37  ;;  %v2041_v37 = vld [vmem:[#allocation7 + $0xf0] ss:$8 sps:$4 sm:$0xff]  }
  0xce   :  { %860 = vmatprep.subr.bf16.mxu0 %v1998_v38  ;;  %v2048_v38 = vld [vmem:[#allocation10 + $0x4] ss:$8 sps:$4 sm:$0xff]  }
  0xd0   :  { %401 = vmatmul.mubr.bf16.vlgmr.msra.gmra.mrb[0].mxu0 %v2700_v39 }
  0xd1   :  { %861 = vmatpush1.bf16.msra.mxu0 %v1996_v40  ;;  %892 = vmatprep.mubr.bf16.mxu0 %v1772_v30  ;;  %v2132_v30 = vld [vmem:[#allocation14 + $0xc0] ss:$8 sps:$4 sm:$0xff]   ;;  %v1771_v40 = vcombine.low %v2694_v27, %v2696_v28  ;;  %v2063_v28 = vld [vmem:[#allocation10 + $0x54] ss:$8 sps:$4 sm:$0xff]  }
  0xd2   :  { %862 = vmatprep.subr.bf16.mxu0 %v2001_v41  ;;  %638 = vmatpush1.bf16.msra.mxu1 %v2132_v30  ;;  %v2046_v41 = vld [vmem:[#allocation10] ss:$8 sps:$4 sm:$0xff]   ;;  %v2171_v30 = vld [vmem:[#allocation8 + $0x94] ss:$8 sps:$4 sm:$0xff]  }
  0xd3   :  { %639 = vmatprep.subr.bf16.mxu1 %v2133_v31  ;;  %v2058_v27 = vld [vmem:[#allocation10 + $0x40] ss:$8 sps:$4 sm:$0xff]   ;;  %v2169_v31 = vld [vmem:[#allocation8 + $0x90] ss:$8 sps:$4 sm:$0xff]  }
  0xd5   :  { %863 = vmatpush1.bf16.msra.mxu0 %v1999_v44  ;;  %v2054_v44 = vld [vmem:[#allocation10 + $0x24] ss:$8 sps:$4 sm:$0xff]  }
  0xd6   :  { %864 = vmatprep.subr.bf16.mxu0 %v2004_v46  ;;  %640 = vmatpush1.bf16.msra.mxu1 %v2135_v34  ;;  %v2057_v46 = vld [vmem:[#allocation10 + $0x34] ss:$8 sps:$4 sm:$0xff]  }
  0xd7   :  { %641 = vmatprep.subr.bf16.mxu1 %v2136_v51  ;;  %v2177_v34 = vld [vmem:[#allocation8 + $0xb4] ss:$8 sps:$4 sm:$0xff]  }
  0xd9   :  { %865 = vmatpush1.bf16.msra.mxu0 %v2002_v49  ;;  %v2061_v49 = vld [vmem:[#allocation10 + $0x50] ss:$8 sps:$4 sm:$0xff]  }
  0xda   :  { %866 = vmatprep.subr.bf16.mxu0 %v2007_v50  ;;  %v2066_v50 = vld [vmem:[#allocation10 + $0x64] ss:$8 sps:$4 sm:$0xff]  }
  0xdd   :  { %867 = vmatpush1.bf16.msra.mxu0 %v2005_v53  ;;  %v2069_v53 = vld [vmem:[#allocation10 + $0x74] ss:$8 sps:$4 sm:$0xff]  }
  0xde   :  { %868 = vmatprep.subr.bf16.mxu0 %v2010_v54  ;;  %v2139_v54 = vld [vmem:[#allocation14 + $0xf4] ss:$8 sps:$4 sm:$0xff]  }
  0xe1   :  { %869 = vmatpush1.bf16.msra.mxu0 %v2008_v57  ;;  %v2067_v57 = vld [vmem:[#allocation10 + $0x70] ss:$8 sps:$4 sm:$0xff]  }
  0xe2   :  { %870 = vmatprep.subr.bf16.mxu0 %v2013_v58  ;;  %v2142_v58 = vld [vmem:[#allocation8] ss:$8 sps:$4 sm:$0xff]  }
  0xe5   :  { %871 = vmatpush1.bf16.msra.mxu0 %v2011_v60  ;;  %v2147_v60 = vld [vmem:[#allocation8 + $0x14] ss:$8 sps:$4 sm:$0xff]  }
  0xe6   :  { %872 = vmatprep.subr.bf16.mxu0 %v2016_v62  ;;  %v2145_v62 = vld [vmem:[#allocation8 + $0x10] ss:$8 sps:$4 sm:$0xff]  }
  0xe9   :  { %873 = vmatpush1.bf16.msra.mxu0 %v2014_v1  ;;  %v2073_v1 = vld [vmem:[#allocation10 + $0x90] ss:$8 sps:$4 sm:$0xff]  }
  0xea   :  { %874 = vmatprep.subr.bf16.mxu0 %v2019_v2  ;;  %v2148_v2 = vld [vmem:[#allocation8 + $0x20] ss:$8 sps:$4 sm:$0xff]  }
  0xed   :  { %875 = vmatpush1.bf16.msra.mxu0 %v2017_v5  ;;  %v2076_v5 = vld [vmem:[#allocation10 + $0xa0] ss:$8 sps:$4 sm:$0xff]  }
  0xee   :  { %876 = vmatprep.subr.bf16.mxu0 %v2022_v6  ;;  %v2151_v6 = vld [vmem:[#allocation8 + $0x30] ss:$8 sps:$4 sm:$0xff]  }
  0xf1   :  { %877 = vmatpush1.bf16.msra.mxu0 %v2020_v9  ;;  %v2079_v9 = vld [vmem:[#allocation10 + $0xb0] ss:$8 sps:$4 sm:$0xff]  }
  0xf2   :  { %878 = vmatprep.subr.bf16.mxu0 %v2025_v10  ;;  %v2154_v10 = vld [vmem:[#allocation8 + $0x40] ss:$8 sps:$4 sm:$0xff]  }
  0xf5   :  { %879 = vmatpush1.bf16.msra.mxu0 %v2023_v13  ;;  %v2082_v13 = vld [vmem:[#allocation10 + $0xc0] ss:$8 sps:$4 sm:$0xff]  }
  0xf6   :  { %880 = vmatprep.subr.bf16.mxu0 %v2028_v14  ;;  %v2157_v14 = vld [vmem:[#allocation8 + $0x50] ss:$8 sps:$4 sm:$0xff]  }
  0xf9   :  { %881 = vmatpush1.bf16.msra.mxu0 %v2026_v18  ;;  %v2085_v18 = vld [vmem:[#allocation10 + $0xd0] ss:$8 sps:$4 sm:$0xff]  }
  0xfa   :  { %882 = vmatprep.subr.bf16.mxu0 %v2031_v19  ;;  %v2160_v19 = vld [vmem:[#allocation8 + $0x60] ss:$8 sps:$4 sm:$0xff]  }
  0xfd   :  { %883 = vmatpush1.bf16.msra.mxu0 %v2029_v22  ;;  %v2088_v22 = vld [vmem:[#allocation10 + $0xe0] ss:$8 sps:$4 sm:$0xff]  }
  0xfe   :  { %884 = vmatprep.subr.bf16.mxu0 %v2034_v23  ;;  %v2163_v23 = vld [vmem:[#allocation8 + $0x70] ss:$8 sps:$4 sm:$0xff]  }
 0x101   :  { %885 = vmatpush1.bf16.msra.mxu0 %v2032_v26  ;;  %v2091_v26 = vld [vmem:[#allocation10 + $0xf0] ss:$8 sps:$4 sm:$0xff]  }
 0x102   :  { %886 = vmatprep.subr.bf16.mxu0 %v2037_v29  ;;  %v2166_v29 = vld [vmem:[#allocation8 + $0x80] ss:$8 sps:$4 sm:$0xff]  }
 0x105   :  { %887 = vmatpush1.bf16.msra.mxu0 %v2035_v32  ;;  %v2174_v32 = vld [vmem:[#allocation8 + $0xa4] ss:$8 sps:$4 sm:$0xff]  }
 0x106   :  { %888 = vmatprep.subr.bf16.mxu0 %v2040_v33  ;;  %v2172_v33 = vld [vmem:[#allocation8 + $0xa0] ss:$8 sps:$4 sm:$0xff]  }
 0x109   :  { %889 = vmatpush1.bf16.msra.mxu0 %v2038_v35  ;;  %v2175_v35 = vld [vmem:[#allocation8 + $0xb0] ss:$8 sps:$4 sm:$0xff]  }
 0x10a   :  { %890 = vmatprep.subr.bf16.mxu0 %v2043_v36  ;;  %v2180_v36 = vld [vmem:[#allocation8 + $0xc4] ss:$8 sps:$4 sm:$0xff]  }
 0x10d   :  { %891 = vmatpush1.bf16.msra.mxu0 %v2041_v37  ;;  %v2178_v37 = vld [vmem:[#allocation8 + $0xc0] ss:$8 sps:$4 sm:$0xff]  }
 0x10e   :  { %1374 = vmatprep.subr.bf16.mxu0 %v2048_v38  ;;  %v2183_v38 = vld [vmem:[#allocation8 + $0xd4] ss:$8 sps:$4 sm:$0xff]  }
 0x110   :  { %893 = vmatmul.mubr.bf16.vlgmr.msra.gmra.mrb[4].mxu0 %v1771_v40 }
 0x111   :  { %1375 = vmatpush1.bf16.msra.mxu0 %v2046_v41  ;;  %1406 = vmatprep.mubr.bf16.mxu0 %v2691_v15  ;;  %v2138_v15 = vld [vmem:[#allocation14 + $0xe0] ss:$8 sps:$4 sm:$0xff]   ;;  %v2186_v41 = vld [vmem:[#allocation8 + $0xe4] ss:$8 sps:$4 sm:$0xff]  }
 0x112   :  { %1376 = vmatprep.subr.bf16.mxu0 %v2051_v42  ;;  %642 = vmatpush1.bf16.msra.mxu1 %v2138_v15  ;;  %v2184_v42 = vld [vmem:[#allocation8 + $0xe0] ss:$8 sps:$4 sm:$0xff]  }
 0x113   :  { %643 = vmatprep.subr.bf16.mxu1 %v2139_v54 }
 0x115   :  { %1377 = vmatpush1.bf16.msra.mxu0 %v2049_v43  ;;  %v2187_v43 = vld [vmem:[#allocation8 + $0xf0] ss:$8 sps:$4 sm:$0xff]  }
 0x116   :  { %1378 = vmatprep.subr.bf16.mxu0 %v2054_v44  ;;  %644 = vmatpush1.bf16.msra.mxu1 %v2141_v55  ;;  %v2192_v44 = vld [vmem:[#allocation11 + $0x4] ss:$8 sps:$4 sm:$0xff]  }
 0x117   :  { %1113 = vmatprep.subr.bf16.mxu1 %v2144_v56 }
 0x119   :  { %1379 = vmatpush1.bf16.msra.mxu0 %v2052_v45  ;;  %646 = vmatmul.mubr.bf16.vlgmr.msra.gmra.mrb[0].mxu1 %v1771_v40  ;;  %v2181_v40 = vld [vmem:[#allocation8 + $0xd0] ss:$8 sps:$4 sm:$0xff]  }
 0x11a   :  { %1380 = vmatprep.subr.bf16.mxu0 %v2057_v46  ;;  %1114 = vmatpush1.bf16.msra.mxu1 %v2142_v58 }
 0x11b   :  { %1115 = vmatprep.subr.bf16.mxu1 %v2147_v60 }
 0x11d   :  { %1381 = vmatpush1.bf16.msra.mxu0 %v2055_v47 }
 0x11e   :  { %1382 = vmatprep.subr.bf16.mxu0 %v2060_v48  ;;  %1116 = vmatpush1.bf16.msra.mxu1 %v2145_v62 }
 0x11f   :  { %1117 = vmatprep.subr.bf16.mxu1 %v2150_v0 }
 0x121   :  { %1383 = vmatpush1.bf16.msra.mxu0 %v2058_v27  ;;  %v690_v27 = vlaneseq }
 0x122   :  { %1384 = vmatprep.subr.bf16.mxu0 %v2063_v28  ;;  %1118 = vmatpush1.bf16.msra.mxu1 %v2148_v2 }
 0x123   :  { %1119 = vmatprep.subr.bf16.mxu1 %v2153_v4  ;;  %v691_v28 = vshrl.u32 %v690_v27, 7  ;;  %v2195_v4 = vld [vmem:[#allocation11 + $0x14] ss:$8 sps:$4 sm:$0xff]  }
 0x124   :  { %v2237_v27 = vld [vmem:[#allocation11 + $0xf4] ss:$8 sps:$4 sm:$0xff]  }
 0x125   :  { %1385 = vmatpush1.bf16.msra.mxu0 %v2061_v49  ;;  %v2715_v49 = vsub.s32 0, %v691_v28  ;;  %v2720_v51 = vsub.s32 1, %v691_v28 }
 0x126   :  { %1386 = vmatprep.subr.bf16.mxu0 %v2066_v50  ;;  %1120 = vmatpush1.bf16.msra.mxu1 %v2151_v6  ;;  %v688_v50 = vld [vmem:[%s2775_s3] sm:$0x3]  ;;  %v2198_v6 = vld [vmem:[#allocation11 + $0x24] ss:$8 sps:$4 sm:$0xff]  }
 0x127   :  { %1121 = vmatprep.subr.bf16.mxu1 %v2156_v8  ;;  %v693_v15 = vrot.slane %v688_v50, %v2715_v49  ;;  %v2201_v8 = vld [vmem:[#allocation11 + $0x34] ss:$8 sps:$4 sm:$0xff]  }
 0x129   :  { %1387 = vmatpush1.bf16.msra.mxu0 %v2064_v52  ;;  %v697_v52 = vrot.slane %v688_v50, %v2720_v51 }
 0x12a   :  { %1388 = vmatprep.subr.bf16.mxu0 %v2069_v53  ;;  %1122 = vmatpush1.bf16.msra.mxu1 %v2154_v10  ;;  %v2204_v10 = vld [vmem:[#allocation11 + $0x44] ss:$8 sps:$4 sm:$0xff]  }
 0x12b   :  { %1123 = vmatprep.subr.bf16.mxu1 %v2159_v12  ;;  %v2207_v12 = vld [vmem:[#allocation11 + $0x54] ss:$8 sps:$4 sm:$0xff]  }
 0x12d   :  { %1389 = vmatpush1.bf16.msra.mxu0 %v2067_v57 }
 0x12e   :  { %1390 = vmatprep.subr.bf16.mxu0 %v2072_v59  ;;  %1124 = vmatpush1.bf16.msra.mxu1 %v2157_v14 }
 0x12f   :  { %1125 = vmatprep.subr.bf16.mxu1 %v2162_v17 }
 0x131   :  { %1391 = vmatpush1.bf16.msra.mxu0 %v2070_v61 }
 0x132   :  { %1392 = vmatprep.subr.bf16.mxu0 %v2075_v63  ;;  %1126 = vmatpush1.bf16.msra.mxu1 %v2160_v19 }
 0x133   :  { %1127 = vmatprep.subr.bf16.mxu1 %v2165_v21  ;;  %v2213_v21 = vld [vmem:[#allocation11 + $0x74] ss:$8 sps:$4 sm:$0xff]  }
 0x135   :  { %1393 = vmatpush1.bf16.msra.mxu0 %v2073_v1 }
 0x136   :  { %1394 = vmatprep.subr.bf16.mxu0 %v2078_v3  ;;  %1128 = vmatpush1.bf16.msra.mxu1 %v2163_v23  ;;  %v2190_v3 = vld [vmem:[#allocation11] ss:$8 sps:$4 sm:$0xff]   ;;  %v2216_v23 = vld [vmem:[#allocation11 + $0x84] ss:$8 sps:$4 sm:$0xff]  }
 0x137   :  { %1129 = vmatprep.subr.bf16.mxu1 %v2168_v25  ;;  %v2219_v25 = vld [vmem:[#allocation11 + $0x94] ss:$8 sps:$4 sm:$0xff]  }
 0x139   :  { %1395 = vmatpush1.bf16.msra.mxu0 %v2076_v5  ;;  %v2193_v5 = vld [vmem:[#allocation11 + $0x10] ss:$8 sps:$4 sm:$0xff]  }
 0x13a   :  { %1396 = vmatprep.subr.bf16.mxu0 %v2081_v7  ;;  %1130 = vmatpush1.bf16.msra.mxu1 %v2166_v29  ;;  %v2196_v7 = vld [vmem:[#allocation11 + $0x20] ss:$8 sps:$4 sm:$0xff]   ;;  %v2222_v29 = vld [vmem:[#allocation11 + $0xa4] ss:$8 sps:$4 sm:$0xff]  }
 0x13b   :  { %1131 = vmatprep.subr.bf16.mxu1 %v2171_v30  ;;  %v2220_v30 = vld [vmem:[#allocation11 + $0xa0] ss:$8 sps:$4 sm:$0xff]  }
 0x13d   :  { %1397 = vmatpush1.bf16.msra.mxu0 %v2079_v9  ;;  %v2199_v9 = vld [vmem:[#allocation11 + $0x30] ss:$8 sps:$4 sm:$0xff]  }
 0x13e   :  { %1398 = vmatprep.subr.bf16.mxu0 %v2084_v11  ;;  %1132 = vmatpush1.bf16.msra.mxu1 %v2169_v31  ;;  %v2202_v11 = vld [vmem:[#allocation11 + $0x40] ss:$8 sps:$4 sm:$0xff]   ;;  %v2225_v31 = vld [vmem:[#allocation11 + $0xb4] ss:$8 sps:$4 sm:$0xff]  }
 0x13f   :  { %1133 = vmatprep.subr.bf16.mxu1 %v2174_v32  ;;  %v2223_v32 = vld [vmem:[#allocation11 + $0xb0] ss:$8 sps:$4 sm:$0xff]  }
 0x141   :  { %1399 = vmatpush1.bf16.msra.mxu0 %v2082_v13  ;;  %v2205_v13 = vld [vmem:[#allocation11 + $0x50] ss:$8 sps:$4 sm:$0xff]  }
 0x142   :  { %1400 = vmatprep.subr.bf16.mxu0 %v2087_v16  ;;  %1134 = vmatpush1.bf16.msra.mxu1 %v2172_v33  ;;  %v2210_v16 = vld [vmem:[#allocation11 + $0x64] ss:$8 sps:$4 sm:$0xff]  }
 0x143   :  { %1135 = vmatprep.subr.bf16.mxu1 %v2177_v34  ;;  %v2228_v33 = vld [vmem:[#allocation11 + $0xc4] ss:$8 sps:$4 sm:$0xff]   ;;  %v2226_v34 = vld [vmem:[#allocation11 + $0xc0] ss:$8 sps:$4 sm:$0xff]  }
 0x145   :  { %1401 = vmatpush1.bf16.msra.mxu0 %v2085_v18 }
 0x146   :  { %1402 = vmatprep.subr.bf16.mxu0 %v2090_v20  ;;  %1136 = vmatpush1.bf16.msra.mxu1 %v2175_v35  ;;  %v2208_v20 = vld [vmem:[#allocation11 + $0x60] ss:$8 sps:$4 sm:$0xff]   ;;  %v2231_v35 = vld [vmem:[#allocation11 + $0xd4] ss:$8 sps:$4 sm:$0xff]  }
 0x147   :  { %1137 = vmatprep.subr.bf16.mxu1 %v2180_v36  ;;  %v1202_v36 = vld [vmem:[%s2779_s7] sm:$0x3] }
 0x149   :  { %1403 = vmatpush1.bf16.msra.mxu0 %v2088_v22  ;;  %v2211_v22 = vld [vmem:[#allocation11 + $0x70] ss:$8 sps:$4 sm:$0xff]  }
 0x14a   :  { %1404 = vmatprep.subr.bf16.mxu0 %v2093_v24  ;;  %1138 = vmatpush1.bf16.msra.mxu1 %v2178_v37  ;;  %v2214_v24 = vld [vmem:[#allocation11 + $0x80] ss:$8 sps:$4 sm:$0xff]   ;;  %v2229_v37 = vld [vmem:[#allocation11 + $0xd0] ss:$8 sps:$4 sm:$0xff]  }
 0x14b   :  { %1139 = vmatprep.subr.bf16.mxu1 %v2183_v38  ;;  %v1207_v38 = vrot.slane %v1202_v36, %v2715_v49 }
 0x14d   :  { %1405 = vmatpush1.bf16.msra.mxu0 %v2091_v26  ;;  %v2217_v26 = vld [vmem:[#allocation11 + $0x90] ss:$8 sps:$4 sm:$0xff]  }
 0x14e   :  { %1140 = vmatpush1.bf16.msra.mxu1 %v2181_v40  ;;  %v2234_v40 = vld [vmem:[#allocation11 + $0xe4] ss:$8 sps:$4 sm:$0xff]  }
 0x14f   :  { %1141 = vmatprep.subr.bf16.mxu1 %v2186_v41  ;;  %v1211_v41 = vrot.slane %v1202_v36, %v2720_v51  ;;  %v2249_v36 = vld [vmem:[#allocation5 + $0x8] sm:$0xff] }
 0x150   :  { %1407 = vmatmul.mubr.bf16.vlgmr.msra.gmra.mrb[8].mxu0 %v2700_v39  ;;  %v2189_v39 = vld [vmem:[#allocation8 + $0xf4] ss:$8 sps:$4 sm:$0xff]  }
 0x152   :  { %1142 = vmatpush1.bf16.msra.mxu1 %v2184_v42 }
 0x153   :  { %1143 = vmatprep.subr.bf16.mxu1 %v2189_v39  ;;  %v2232_v39 = vld [vmem:[#allocation11 + $0xe0] ss:$8 sps:$4 sm:$0xff]  }
 0x156   :  { %1144 = vmatpush1.bf16.msra.mxu1 %v2187_v43 }
 0x157   :  { %1627 = vmatprep.subr.bf16.mxu1 %v2192_v44 }
 0x1a3   :  { %v2707_v45 = vpop.f32.mrb[0].mxu0 }
 0x1a4   :  { %v2709_v46 = vpop.f32.mrb[1].mxu0 }
 0x1a5   :  { %v2711_v47 = vpop.f32.mrb[2].mxu0 }
 0x1a6   :  { %v2713_v48 = vpop.f32.mrb[3].mxu0 }
 0x1e3   :  { %v894_v53 = vpop.f32.mrb[4].mxu0 }
 0x1e4   :  { %v895_v54 = vadd.f32 %v894_v53, %v693_v15  ;;  %v896_v55 = vpop.f32.mrb[5].mxu0 }
 0x1e5   :  { %v897_v56 = vadd.f32 %v896_v55, %v697_v52  ;;  %v898_v57 = vpop.f32.mrb[6].mxu0 }
 0x1e6   :  { %v903_v58 = vmax.f32 %v895_v54, 0.0  ;;  %v899_v59 = vadd.f32 %v898_v57, %v693_v15  ;;  %v900_v60 = vpop.f32.mrb[7].mxu0  ;;  %v2235_v54 = vld [vmem:[#allocation11 + $0xf0] ss:$8 sps:$4 sm:$0xff]  }
 0x1e7   :  { %v901_v61 = vadd.f32 %v900_v60, %v697_v52  ;;  %v904_v63 = vmax.f32 %v897_v56, 0.0 }
 0x1e8   :  { %v905_v62 = vmax.f32 %v899_v59, 0.0 }
 0x1e9   :  { %v906_v0 = vmax.f32 %v901_v61, 0.0  ;;  %v941_v61 = vld [vmem:[%s2777_s5] sm:$0x3] }
 0x1ea   :  { %v907_v1 = vpack.c.bf16 %v905_v62, %v903_v58  ;;  %v946_v62 = vrot.slane %v941_v61, %v2715_v49 }
 0x1eb   :  { %v908_v2 = vpack.c.bf16 %v906_v0, %v904_v63  ;;  %v950_v63 = vrot.slane %v941_v61, %v2720_v51  ;;  %v2246_v0 = vld [vmem:[#allocation2] sm:$0xff] }
 0x1ec   :  { %v2724_v14 = vpop.f32.mrb[0].mxu1 }
 0x1ed   :  { %1145 = vmatprep.mubr.bf16.mxu1 %v908_v2  ;;  %v2726_v17 = vpop.f32.mrb[1].mxu1 }
 0x1ee   :  { %1146 = vmatmul.mubr.bf16.vlgmr.msra.gmra.mrb[4].mxu1 %v907_v1  ;;  %v2728_v18 = vpop.f32.mrb[2].mxu1  ;;  %v158_v1 = vunpack.c.l.bf16 %v2246_v0 }
 0x1ef   :  { %1628 = vmatpush1.bf16.msra.mxu1 %v2190_v3  ;;  %v2730_v19 = vpop.f32.mrb[3].mxu1  ;;  %v159_v3 = vunpack.c.h.bf16 %v2246_v0 }
 0x1f0   :  { %1629 = vmatprep.subr.bf16.mxu1 %v2195_v4 }
 0x1f3   :  { %1630 = vmatpush1.bf16.msra.mxu1 %v2193_v5 }
 0x1f4   :  { %1631 = vmatprep.subr.bf16.mxu1 %v2198_v6  ;;  %v2247_v6 = vld [vmem:[#allocation2 + $0x8] sm:$0xff] }
 0x1f7   :  { %1632 = vmatpush1.bf16.msra.mxu1 %v2196_v7  ;;  %v160_v7 = vunpack.c.l.bf16 %v2247_v6 }
 0x1f8   :  { %1633 = vmatprep.subr.bf16.mxu1 %v2201_v8 }
 0x1fb   :  { %1634 = vmatpush1.bf16.msra.mxu1 %v2199_v9 }
 0x1fc   :  { %1635 = vmatprep.subr.bf16.mxu1 %v2204_v10  ;;  %v161_v10 = vunpack.c.h.bf16 %v2247_v6 }
 0x1ff   :  { %1636 = vmatpush1.bf16.msra.mxu1 %v2202_v11 }
 0x200   :  { %1637 = vmatprep.subr.bf16.mxu1 %v2207_v12 }
 0x203   :  { %1638 = vmatpush1.bf16.msra.mxu1 %v2205_v13 }
 0x204   :  { %1639 = vmatprep.subr.bf16.mxu1 %v2210_v16 }
 0x207   :  { %1640 = vmatpush1.bf16.msra.mxu1 %v2208_v20 }
 0x208   :  { %1641 = vmatprep.subr.bf16.mxu1 %v2213_v21 }
 0x20b   :  { %1642 = vmatpush1.bf16.msra.mxu1 %v2211_v22 }
 0x20c   :  { %1643 = vmatprep.subr.bf16.mxu1 %v2216_v23 }
 0x20f   :  { %1644 = vmatpush1.bf16.msra.mxu1 %v2214_v24 }
 0x210   :  { %1645 = vmatprep.subr.bf16.mxu1 %v2219_v25  ;;  %v1455_v25 = vld [vmem:[%s2781_s9] sm:$0x3] }
 0x213   :  { %1646 = vmatpush1.bf16.msra.mxu1 %v2217_v26  ;;  %v1460_v26 = vrot.slane %v1455_v25, %v2715_v49 }
 0x214   :  { %1647 = vmatprep.subr.bf16.mxu1 %v2222_v29  ;;  %v1464_v29 = vrot.slane %v1455_v25, %v2720_v51 }
 0x217   :  { %1648 = vmatpush1.bf16.msra.mxu1 %v2220_v30  ;;  %v2248_v30 = vld [vmem:[#allocation5] sm:$0xff] }
 0x218   :  { %1649 = vmatprep.subr.bf16.mxu1 %v2225_v31  ;;  %v162_v31 = vunpack.c.l.bf16 %v2248_v30 }
 0x21b   :  { %1650 = vmatpush1.bf16.msra.mxu1 %v2223_v32 }
 0x21c   :  { %1651 = vmatprep.subr.bf16.mxu1 %v2228_v33  ;;  %v163_v33 = vunpack.c.h.bf16 %v2248_v30 }
 0x21f   :  { %1652 = vmatpush1.bf16.msra.mxu1 %v2226_v34 }
 0x220   :  { %1653 = vmatprep.subr.bf16.mxu1 %v2231_v35 }
 0x223   :  { %v1408_v42 = vpop.f32.mrb[8].mxu0  ;;  %1654 = vmatpush1.bf16.msra.mxu1 %v2229_v37  ;;  %v164_v37 = vunpack.c.l.bf16 %v2249_v36 }
 0x224   :  { %v1409_v43 = vadd.f32 %v1408_v42, %v1207_v38  ;;  %v1410_v44 = vpop.f32.mrb[9].mxu0  ;;  %1655 = vmatprep.subr.bf16.mxu1 %v2234_v40 }
 0x225   :  { %v1411_v28 = vadd.f32 %v1410_v44, %v1211_v41  ;;  %v1412_v50 = vpop.f32.mrb[10].mxu0 }
 0x226   :  { %v1413_v15 = vadd.f32 %v1412_v50, %v1207_v38  ;;  %v1414_v52 = vpop.f32.mrb[11].mxu0  ;;  %v1417_v55 = vmax.f32 %v1409_v43, 0.0 }
 0x227   :  { %v1415_v53 = vadd.f32 %v1414_v52, %v1211_v41  ;;  %1656 = vmatpush1.bf16.msra.mxu1 %v2232_v39  ;;  %v1418_v57 = vmax.f32 %v1411_v28, 0.0  ;;  %v165_v41 = vunpack.c.h.bf16 %v2249_v36 }
 0x228   :  { %v1419_v56 = vmax.f32 %v1413_v15, 0.0  ;;  %1657 = vmatprep.subr.bf16.mxu1 %v2237_v27 }
 0x229   :  { %v1420_v58 = vmax.f32 %v1415_v53, 0.0 }
 0x22a   :  { %v1421_v59 = vpack.c.bf16 %v1419_v56, %v1417_v55 }
 0x22b   :  { %v1422_v60 = vpack.c.bf16 %v1420_v58, %v1418_v57  ;;  %1658 = vmatpush1.bf16.msra.mxu1 %v2235_v54 }
 0x22d   :  { %1659 = vmatprep.mubr.bf16.mxu1 %v1422_v60  ;;  %v1696_v60 = vld [vmem:[%s2784_s12] sm:$0x3]  ;;  %s2470_s12 = smov [#allocation16]  }
 0x22e   :  { %1660 = vmatmul.mubr.bf16.vlgmr.msra.gmra.mrb[8].mxu1 %v1421_v59  ;;  %v1701_v0 = vrot.slane %v1696_v60, %v2715_v49  ;;  %s1721_s17 = sshll.u32 %s2470_s12, 4  ;;  %s1722_s17 = int_to_ptr.vmem [resolvable:$true] %s1721_s17 }
 0x22f   :  { %s2426_s0 = scalar_lea.vmem %s1722_s17, 512  ;;  %p2431_p9 = scmp.lt.s32.totalorder %s1722_s17, %s1722_s17 }
 0x230   :  { %p2427_p8 = scmp.ne.s32.totalorder %s1722_s17, %s2426_s0  ;;  %p2432_p10 = scmp.lt.s32.totalorder %s2426_s0, %s2426_s0 }
 0x232   :  { %p2433_p11 = por %p2432_p10, %p2431_p9 }
 0x234   :  { %p2434_p12 = pnand %p2433_p11, %p2427_p8 }
 0x2c1   :  { %v1147_v2 = vpop.f32.mrb[4].mxu1 }
 0x2c2   :  { %v1148_v4 = vadd.f32 %v1147_v2, %v946_v62  ;;  %v1149_v5 = vpop.f32.mrb[5].mxu1 }
 0x2c3   :  { %v1150_v8 = vadd.f32 %v1149_v5, %v950_v63  ;;  %v1151_v9 = vpop.f32.mrb[6].mxu1 }
 0x2c4   :  { %v1152_v11 = vadd.f32 %v1151_v9, %v946_v62  ;;  %v1153_v12 = vpop.f32.mrb[7].mxu1  ;;  %v1156_v13 = vmul.f32 %v1148_v4, %v158_v1  ;;  %v1705_v1 = vrot.slane %v1696_v60, %v2720_v51 }
 0x2c5   :  { %v1154_v16 = vadd.f32 %v1153_v12, %v950_v63  ;;  %v1157_v20 = vmul.f32 %v1150_v8, %v159_v3 }
 0x2c6   :  { %v1158_v21 = vmul.f32 %v1152_v11, %v160_v7 }
 0x2c7   :  { %v1159_v22 = vmul.f32 %v1154_v16, %v161_v10  ;;  %v1160_v23 = vadd.f32 %v1157_v20, %v1156_v13 }
 0x2c9   :  { %1161 = vadd.xlane.f32.xlu0 %v1160_v23  ;;  %v1163_v24 = vadd.f32 %v1159_v22, %v1158_v21 }
 0x2cd   :  { %1164 = vadd.xlane.f32.xlu0 %v1163_v24 }
 0x301   :  { %v1661_v32 = vpop.f32.mrb[8].mxu1 }
 0x302   :  { %v1662_v34 = vadd.f32 %v1661_v32, %v1460_v26  ;;  %v1663_v35 = vpop.f32.mrb[9].mxu1 }
 0x303   :  { %v1664_v38 = vadd.f32 %v1663_v35, %v1464_v29  ;;  %v1665_v40 = vpop.f32.mrb[10].mxu1 }
 0x304   :  { %v1666_v42 = vadd.f32 %v1665_v40, %v1460_v26  ;;  %v1667_v39 = vpop.f32.mrb[11].mxu1  ;;  %v1670_v43 = vmul.f32 %v1662_v34, %v162_v31 }
 0x305   :  { %v1668_v44 = vadd.f32 %v1667_v39, %v1464_v29  ;;  %v1671_v27 = vmul.f32 %v1664_v38, %v163_v33 }
 0x306   :  { %v1672_v28 = vmul.f32 %v1666_v42, %v164_v37 }
 0x307   :  { %v1673_v50 = vmul.f32 %v1668_v44, %v165_v41  ;;  %v1674_v15 = vadd.f32 %v1671_v27, %v1670_v43 }
 0x309   :  { %1675 = vadd.xlane.f32.xlu1 %v1674_v15  ;;  %v1677_v52 = vadd.f32 %v1673_v50, %v1672_v28 }
 0x30d   :  { %1678 = vadd.xlane.f32.xlu1 %v1677_v52 }
 0x356   :  { %v1162_v53 = vpop.xlane.xlu0 %1161 }
 0x357   :  { %2238 = vtanh.f32 %v1162_v53 }
 0x35a   :  { %v1165_v54 = vpop.xlane.xlu0 %1164 }
 0x35b   :  { %2240 = vtanh.f32 %v1165_v54 }
 0x361   :  { %v2239_v57 = vpop.eup %2238 }
 0x362   :  { %v1168_v59 = vadd.f32 1.0, %v2239_v57 }
 0x364   :  { %v1684_v2 = vmul.f32 %v1168_v59, %v2707_v45  ;;  %v1685_v3 = vmul.f32 %v1168_v59, %v2709_v46 }
 0x365   :  { %v2241_v58 = vpop.eup %2240 }
 0x366   :  { %v1169_v63 = vadd.f32 1.0, %v2241_v58 }
 0x368   :  { %v1686_v10 = vmul.f32 %v1169_v63, %v2711_v47  ;;  %v1687_v11 = vmul.f32 %v1169_v63, %v2713_v48 }
 0x396   :  { %v1676_v55 = vpop.xlane.xlu1 %1675 }
 0x397   :  { %2242 = vtanh.f32 %v1676_v55 }
 0x39a   :  { %v1679_v56 = vpop.xlane.xlu1 %1678 }
 0x39b   :  { %2244 = vtanh.f32 %v1679_v56 }
 0x3a1   :  { %v2243_v61 = vpop.eup %2242 }
 0x3a2   :  { %v1682_v62 = vadd.f32 1.0, %v2243_v61 }
 0x3a4   :  { %v1688_v4 = vmul.f32 %v1682_v62, %v2724_v14  ;;  %v1689_v5 = vmul.f32 %v1682_v62, %v2726_v17 }
 0x3a5   :  { %v2245_v6 = vpop.eup %2244 }
 0x3a6   :  { %v1692_v7 = vadd.f32 %v1688_v4, %v1684_v2  ;;  %v1693_v8 = vadd.f32 %v1689_v5, %v1685_v3  ;;  %v1683_v9 = vadd.f32 1.0, %v2245_v6 }
 0x3a8   :  { %v1708_v12 = vadd.f32 %v1701_v0, %v1692_v7  ;;  %v1709_v49 = vadd.f32 %v1705_v1, %v1693_v8  ;;  %v1690_v51 = vmul.f32 %v1683_v9, %v2728_v18  ;;  %v1691_v45 = vmul.f32 %v1683_v9, %v2730_v19 }
 0x3aa   :  { %1712 = vst [vmem:[#allocation16] sm:$0xff] %v1708_v12  ;;  %1713 = vst [vmem:[#allocation16 + $0x8] sm:$0xff] %v1709_v49  ;;  %v1694_v46 = vadd.f32 %v1690_v51, %v1686_v10  ;;  %v1695_v14 = vadd.f32 %v1691_v45, %v1687_v11 }
 0x3ac   :  { %v1710_v17 = vadd.f32 %v1701_v0, %v1694_v46  ;;  %v1711_v13 = vadd.f32 %v1705_v1, %v1695_v14 }
 0x3ae   :  { %1714 = vst [vmem:[#allocation16 + $0x10] sm:$0xff] %v1710_v17  ;;  %1715 = vst [vmem:[#allocation16 + $0x18] sm:$0xff] %v1711_v13 }
 0x3af   :  { %2437 = shalt.err (!%p2434_p12)
}
 0x3b0   :  { %s2438_s23 = scalar_lea.hbm %s2785_s13, 512 }
 0x3b1   :  { %p2439_p13 = scmp.ne.s32.totalorder %s2785_s13, %s2438_s23  ;;  %p2442_p0 = scmp.lt.u32.totalorder %s2438_s23, %s2785_s13 }
 0x3b3   :  { %p2444_p1 = pnand %p2442_p0, %p2439_p13 }
 0x3b5   :  { %2447 = shalt.err (!%p2444_p1)
}
 0x3b6   :  { %s2471_s8 = smov 256   ;;  %s2472_s18 = smov 16  }
 0x3b7   :  { %1727 = dma.vmem_to_hbm [thread:$0]  %s1722_s17, 512, %s2785_s13, [#allocation4], %s2471_s8, %s2471_s8, %s2472_s18  }
 0x3b8   :  { %2458 = dma.done.wait [#allocation4], 512  }
 0x3b9   :  { %2459 = vsyncadd [#allocation4], 4294966784 }
 0x3ba   :  { %1731 = vsyncpa [#allocation3], 1 }
 0x3bb   :  { %1732 = vsyncpa [#allocation6], 1 }
 0x3bc   :  { %1733 = vsyncpa [#allocation9], 1 }
 0x3bd   :  { %1734 = vsyncpa [#allocation12], 1 }
 0x3be   :  { %1735 = vsyncpa [#allocation15], 1 }
 0x3bf   :  { %1736 = vsyncpa [#allocation4], 1 }

</bundles_post_ra>
